<compile_context>
chip_gen: v6e
topology: v6e:2x2x1
jax: 0.10.0
libtpu: 0.0.40
codegen_flags: <defaults>
</compile_context>

<pallas_src>
import functools

import jax
import jax.numpy as jnp
import numpy as np
from jax.experimental import pallas as pl
from jax.experimental.pallas import tpu as pltpu


# ------------------------------------------------------------------ helpers

def _roll_lanes(img, shift):
    """Circular shift along the last (lane) axis: out[:, p] = img[:, (p+shift) % HW].

    `shift` is a Python int, so this lowers to two static lane slices and one
    lane-dim concatenate (no gather, no strided ref access).
    """
    hw = img.shape[-1]
    shift = shift % hw
    if shift == 0:
        return img
    return jnp.concatenate([img[:, shift:], img[:, :shift]], axis=1)


def _im2col_3x3(img, masks, W):
    """Build the (9*C, H*W) im2col matrix of a 3x3 / padding=1 convolution.

    img:   (C, H*W) activation, spatial flattened row-major (p = y*W + x).
    masks: (9, H*W) constant 0/1 boundary masks, row order (kh, kw).
    Row order of the result is (kh, kw, c), matching the weight re-layout done
    in the wrapper (OIHW -> (Cout, kh*kw*Cin)).
    """
    patches = []
    for kh in range(3):
        for kw in range(3):
            k = kh * 3 + kw
            shift = (kh - 1) * W + (kw - 1)
            patches.append(_roll_lanes(img, shift) * masks[k:k + 1, :])
    return jnp.concatenate(patches, axis=0)


def _conv3x3_masks(H, W):
    """(9, H*W) 0/1 masks zeroing pixels whose 3x3 tap falls outside the image."""
    ys, xs = np.meshgrid(np.arange(H), np.arange(W), indexing="ij")
    ys, xs = ys.reshape(-1), xs.reshape(-1)
    m = np.zeros((9, H * W), np.float32)
    for kh in range(3):
        for kw in range(3):
            valid = ((ys + kh - 1 >= 0) & (ys + kh - 1 < H)
                     & (xs + kw - 1 >= 0) & (xs + kw - 1 < W))
            m[kh * 3 + kw] = valid.astype(np.float32)
    return jnp.asarray(m)


def _avgpool2_matrix(H, W):
    """(H*W, H/2*W/2) matrix P such that (C,HW) @ P == 2x2 avg-pool, stride 2."""
    Ho, Wo = H // 2, W // 2
    P = np.zeros((H * W, Ho * Wo), np.float32)
    for y in range(H):
        for x in range(W):
            P[y * W + x, (y // 2) * Wo + (x // 2)] = 0.25
    return jnp.asarray(P)


# ------------------------------------------------------------------- kernel

def _dblock_kernel(x_ref, w1_ref, w2_ref, wsc_ref, pool_ref, mask_ref, o_ref, *,
                   H, W, pre_leaky, downsample, learnable_sc):
    f32 = jnp.float32
    hi = jax.lax.Precision.HIGHEST

    x = x_ref[0].astype(f32)                            # (Cin, H*W), lane-dense
    masks = mask_ref[...].astype(f32)                   # (9, H*W)

    # ---- residual branch: (lrelu ->) conv1 -> lrelu -> conv2 (-> avgpool2)
    h = jnp.where(x >= 0, x, 0.2 * x) if pre_leaky else x
    cols = _im2col_3x3(h, masks, W)                     # (9*Cin, H*W)
    h = jnp.dot(w1_ref[...].astype(f32), cols,
                precision=hi, preferred_element_type=f32)        # (Cout, H*W)
    h = jnp.where(h >= 0, h, 0.2 * h)
    cols = _im2col_3x3(h, masks, W)                     # (9*Cout, H*W)
    h = jnp.dot(w2_ref[...].astype(f32), cols,
                precision=hi, preferred_element_type=f32)        # (Cout, H*W)
    if downsample:                                      # avg-pool as matmul epilogue
        h = jnp.dot(h, pool_ref[...].astype(f32),
                    precision=hi, preferred_element_type=f32)    # (Cout, H*W/4)

    # ---- shortcut branch
    s = x
    if learnable_sc:
        if downsample:
            # 2x2 avg-pool commutes exactly with a 1x1 conv; pooling first is 4x cheaper.
            s = jnp.dot(s, pool_ref[...].astype(f32),
                        precision=hi, preferred_element_type=f32)
        s = jnp.dot(wsc_ref[...].astype(f32), s,
                    precision=hi, preferred_element_type=f32)    # (Cout, ...)
    # (not learnable_sc implies downsample=False and Cin==Cout, so shapes match)

    o_ref[0] = (s + h).astype(o_ref.dtype)


# ------------------------------------------------------------------ wrapper

def dblock_forward(x_nchw, w1_oihw, w2_oihw, wsc_oihw=None, *,
                   downsample, optimized, learnable_sc):
    """Matches DBlock.forward: shortcut(x) + residual(x).  x is NCHW."""
    N, Cin, H, W = x_nchw.shape
    Cout = w1_oihw.shape[0]
    HW = H * W
    Ho, Wo = (H // 2, W // 2) if downsample else (H, W)
    HWo = Ho * Wo
    dtype = x_nchw.dtype

    # ---- parameter / layout glue (cheap XLA ops, outside the kernel) -----
    # OIHW -> (Cout, 9*Cin), row order (kh, kw, cin) matching the im2col.
    w1_mat = jnp.transpose(w1_oihw, (0, 2, 3, 1)).reshape(Cout, 9 * Cin)
    w2_mat = jnp.transpose(w2_oihw, (0, 2, 3, 1)).reshape(Cout, 9 * Cout)
    if learnable_sc:
        wsc_mat = wsc_oihw[:, :, 0, 0]                  # (Cout, Cin)
    else:
        wsc_mat = jnp.zeros((Cout, Cin), dtype)         # unused (static branch)
    if downsample:
        pool = _avgpool2_matrix(H, W)                   # (HW, HW/4) constant
    else:
        pool = jnp.zeros((8, 128), jnp.float32)         # unused dummy
    masks = _conv3x3_masks(H, W)                        # (9, HW) constant

    x_flat = x_nchw.reshape(N, Cin, HW)                 # channels-major, spatial on lanes

    kernel = functools.partial(
        _dblock_kernel, H=H, W=W, pre_leaky=not optimized,
        downsample=downsample, learnable_sc=learnable_sc)

    out_flat = pl.pallas_call(
        kernel,
        out_shape=jax.ShapeDtypeStruct((N, Cout, HWo), dtype),
        grid=(N,),
        in_specs=[
            pl.BlockSpec((1, Cin, HW), lambda n: (n, 0, 0)),
            pl.BlockSpec((Cout, 9 * Cin), lambda n: (0, 0)),
            pl.BlockSpec((Cout, 9 * Cout), lambda n: (0, 0)),
            pl.BlockSpec((Cout, Cin), lambda n: (0, 0)),
            pl.BlockSpec(pool.shape, lambda n: (0, 0)),
            pl.BlockSpec((9, HW), lambda n: (0, 0)),
        ],
        out_specs=pl.BlockSpec((1, Cout, HWo), lambda n: (n, 0, 0)),
        compiler_params=pltpu.CompilerParams(
            dimension_semantics=("parallel",)),         # split batch across TCs on v7x
    )(x_flat, w1_mat, w2_mat, wsc_mat, pool, masks)

    return out_flat.reshape(N, Cout, Ho, Wo)            # NCHW out (free reshape)


# ----------------------------------------------------- params / reference

def orthogonal_init(key, shape):
    """nn.init.orthogonal_ equivalent on an OIHW conv weight (deterministic)."""
    rows = shape[0]
    cols = int(np.prod(shape[1:]))
    n = max(rows, cols)
    a = jax.random.normal(key, (n, n), jnp.float32)
    q, r = jnp.linalg.qr(a)
    q = q * jnp.sign(jnp.diag(r))[None, :]
    return q[:rows, :cols].reshape(shape)


def spectral_normalize(key, w_oihw, n_iter=1, eps=1e-12):
    """torch spectral_norm semantics: W / sigma, sigma via power iteration."""
    out_c = w_oihw.shape[0]
    w_mat = w_oihw.reshape(out_c, -1)
    u = jax.random.normal(key, (out_c,), jnp.float32)
    u = u / (jnp.linalg.norm(u) + eps)
    v = None
    for _ in range(n_iter):
        v = w_mat.T @ u
        v = v / (jnp.linalg.norm(v) + eps)
        u = w_mat @ v
        u = u / (jnp.linalg.norm(u) + eps)
    sigma = u @ (w_mat @ v)
    return w_oihw / sigma


def _leaky_ref(x):
    return jnp.where(x >= 0, x, 0.2 * x)


def _avgpool_ref(x_nchw):
    N, C, H, W = x_nchw.shape
    return x_nchw.reshape(N, C, H // 2, 2, W // 2, 2).mean(axis=(3, 5))


def _conv_ref(x, w_oihw, padding):
    return jax.lax.conv_general_dilated(
        x, w_oihw, window_strides=(1, 1), padding=padding,
        dimension_numbers=('NCHW', 'OIHW', 'NCHW'),
        precision=jax.lax.Precision.HIGHEST)


def dblock_ref(x, w1, w2, wsc, *, downsample, optimized, learnable_sc):
    h = x if optimized else _leaky_ref(x)
    h = _conv_ref(h, w1, 'SAME')
    h = _leaky_ref(h)
    h = _conv_ref(h, w2, 'SAME')
    if downsample:
        h = _avgpool_ref(h)
    s = x
    if learnable_sc:
        if optimized:
            s = _conv_ref(_avgpool_ref(s) if downsample else s, wsc, 'VALID')
        else:
            s = _conv_ref(s, wsc, 'VALID')
            if downsample:
                s = _avgpool_ref(s)
    return s + h


# ------------------------------------------------------------------- main

if __name__ == "__main__":
    key = jax.random.PRNGKey(0)
    kx, k1, k2, k3, ku1, ku2, ku3 = jax.random.split(key, 7)

    N, Cin, Cout, S = 2, 4, 8, 16
    downsample, optimized = True, False
    learnable_sc = (Cin != Cout) or downsample

    x = jax.random.normal(kx, (N, Cin, S, S), jnp.float32)      # NCHW like PyTorch

    # Deterministic parameter setup: orthogonal init + spectral norm (glue).
    w1 = spectral_normalize(ku1, orthogonal_init(k1, (Cout, Cin, 3, 3)))
    w2 = spectral_normalize(ku2, orthogonal_init(k2, (Cout, Cout, 3, 3)))
    wsc = spectral_normalize(ku3, orthogonal_init(k3, (Cout, Cin, 1, 1)))

    fwd = jax.jit(functools.partial(
        dblock_forward, downsample=downsample, optimized=optimized,
        learnable_sc=learnable_sc))
    out = jax.block_until_ready(fwd(x, w1, w2, wsc))

    ref = jax.block_until_ready(
        dblock_ref(x, w1, w2, wsc, downsample=downsample,
                   optimized=optimized, learnable_sc=learnable_sc))

    assert out.shape == (N, Cout, S // 2, S // 2), out.shape
    np.testing.assert_allclose(np.asarray(out), np.asarray(ref),
                               rtol=1e-4, atol=1e-4)
    print("KERNEL_OK")
</pallas_src>

<mosaic_0001>
module attributes {stable_mosaic.version = 11 : i64} {
  func.func @_dblock_kernel(%arg0: i32, %arg1: memref<1x4x256xf32, #tpu.memory_space<vmem>>, %arg2: memref<8x36xf32, #tpu.memory_space<vmem>>, %arg3: memref<8x72xf32, #tpu.memory_space<vmem>>, %arg4: memref<8x4xf32, #tpu.memory_space<vmem>>, %arg5: memref<256x64xf32, #tpu.memory_space<vmem>>, %arg6: memref<9x256xf32, #tpu.memory_space<vmem>>, %arg7: memref<1x8x64xf32, #tpu.memory_space<vmem>>) attributes {dimension_semantics = [#tpu.dimension_semantics<parallel>], iteration_bounds = array<i64: 2>, scalar_prefetch = 0 : i64, scratch_operands = 0 : i64, tpu.core_type = #tpu.core_type<tc>, window_params = [{transform_indices = @transform_0, window_bounds = array<i64: 1, 4, 256>}, {pipeline_mode = #tpu.pipeline_mode<synchronous>, transform_indices = @transform_1, window_bounds = array<i64: 8, 36>}, {pipeline_mode = #tpu.pipeline_mode<synchronous>, transform_indices = @transform_2, window_bounds = array<i64: 8, 72>}, {pipeline_mode = #tpu.pipeline_mode<synchronous>, transform_indices = @transform_3, window_bounds = array<i64: 8, 4>}, {pipeline_mode = #tpu.pipeline_mode<synchronous>, transform_indices = @transform_4, window_bounds = array<i64: 256, 64>}, {pipeline_mode = #tpu.pipeline_mode<synchronous>, transform_indices = @transform_5, window_bounds = array<i64: 9, 256>}, {transform_indices = @transform_6, window_bounds = array<i64: 1, 8, 64>}]} {
    %c0 = arith.constant 0 : index
    %c0_0 = arith.constant 0 : index
    %c0_1 = arith.constant 0 : index
    %0 = vector.load %arg1[%c0, %c0_0, %c0_1] : memref<1x4x256xf32, #tpu.memory_space<vmem>>, vector<1x4x256xf32>
    %1 = vector.shape_cast %0 : vector<1x4x256xf32> to vector<4x256xf32>
    %c0_2 = arith.constant 0 : index
    %c0_3 = arith.constant 0 : index
    %2 = vector.load %arg6[%c0_2, %c0_3] : memref<9x256xf32, #tpu.memory_space<vmem>>, vector<9x256xf32>
    %cst = arith.constant 0.000000e+00 : f32
    %3 = vector.broadcast %cst : f32 to vector<4x256xf32>
    %4 = arith.cmpf oge, %1, %3 : vector<4x256xf32>
    %cst_4 = arith.constant 2.000000e-01 : f32
    %5 = vector.broadcast %cst_4 : f32 to vector<4x256xf32>
    %6 = arith.mulf %5, %1 : vector<4x256xf32>
    %7 = arith.select %4, %1, %6 : vector<4x256xi1>, vector<4x256xf32>
    %8 = vector.extract_strided_slice %7 {offsets = [0, 239], sizes = [4, 17], strides = [1, 1]} : vector<4x256xf32> to vector<4x17xf32>
    %9 = vector.extract_strided_slice %7 {offsets = [0, 0], sizes = [4, 239], strides = [1, 1]} : vector<4x256xf32> to vector<4x239xf32>
    %10 = tpu.concatenate %8, %9 in 1 : vector<4x17xf32>, vector<4x239xf32> -> vector<4x256xf32>
    %11 = vector.extract_strided_slice %2 {offsets = [0, 0], sizes = [1, 256], strides = [1, 1]} : vector<9x256xf32> to vector<1x256xf32>
    %12 = vector.broadcast %11 : vector<1x256xf32> to vector<4x256xf32>
    %13 = arith.mulf %10, %12 : vector<4x256xf32>
    %14 = vector.extract_strided_slice %7 {offsets = [0, 240], sizes = [4, 16], strides = [1, 1]} : vector<4x256xf32> to vector<4x16xf32>
    %15 = vector.extract_strided_slice %7 {offsets = [0, 0], sizes = [4, 240], strides = [1, 1]} : vector<4x256xf32> to vector<4x240xf32>
    %16 = tpu.concatenate %14, %15 in 1 : vector<4x16xf32>, vector<4x240xf32> -> vector<4x256xf32>
    %17 = vector.extract_strided_slice %2 {offsets = [1, 0], sizes = [1, 256], strides = [1, 1]} : vector<9x256xf32> to vector<1x256xf32>
    %18 = vector.broadcast %17 : vector<1x256xf32> to vector<4x256xf32>
    %19 = arith.mulf %16, %18 : vector<4x256xf32>
    %20 = vector.extract_strided_slice %7 {offsets = [0, 241], sizes = [4, 15], strides = [1, 1]} : vector<4x256xf32> to vector<4x15xf32>
    %21 = vector.extract_strided_slice %7 {offsets = [0, 0], sizes = [4, 241], strides = [1, 1]} : vector<4x256xf32> to vector<4x241xf32>
    %22 = tpu.concatenate %20, %21 in 1 : vector<4x15xf32>, vector<4x241xf32> -> vector<4x256xf32>
    %23 = vector.extract_strided_slice %2 {offsets = [2, 0], sizes = [1, 256], strides = [1, 1]} : vector<9x256xf32> to vector<1x256xf32>
    %24 = vector.broadcast %23 : vector<1x256xf32> to vector<4x256xf32>
    %25 = arith.mulf %22, %24 : vector<4x256xf32>
    %26 = vector.extract_strided_slice %7 {offsets = [0, 255], sizes = [4, 1], strides = [1, 1]} : vector<4x256xf32> to vector<4x1xf32>
    %27 = vector.extract_strided_slice %7 {offsets = [0, 0], sizes = [4, 255], strides = [1, 1]} : vector<4x256xf32> to vector<4x255xf32>
    %28 = tpu.concatenate %26, %27 in 1 : vector<4x1xf32>, vector<4x255xf32> -> vector<4x256xf32>
    %29 = vector.extract_strided_slice %2 {offsets = [3, 0], sizes = [1, 256], strides = [1, 1]} : vector<9x256xf32> to vector<1x256xf32>
    %30 = vector.broadcast %29 : vector<1x256xf32> to vector<4x256xf32>
    %31 = arith.mulf %28, %30 : vector<4x256xf32>
    %32 = vector.extract_strided_slice %2 {offsets = [4, 0], sizes = [1, 256], strides = [1, 1]} : vector<9x256xf32> to vector<1x256xf32>
    %33 = vector.broadcast %32 : vector<1x256xf32> to vector<4x256xf32>
    %34 = arith.mulf %7, %33 : vector<4x256xf32>
    %35 = vector.extract_strided_slice %7 {offsets = [0, 1], sizes = [4, 255], strides = [1, 1]} : vector<4x256xf32> to vector<4x255xf32>
    %36 = vector.extract_strided_slice %7 {offsets = [0, 0], sizes = [4, 1], strides = [1, 1]} : vector<4x256xf32> to vector<4x1xf32>
    %37 = tpu.concatenate %35, %36 in 1 : vector<4x255xf32>, vector<4x1xf32> -> vector<4x256xf32>
    %38 = vector.extract_strided_slice %2 {offsets = [5, 0], sizes = [1, 256], strides = [1, 1]} : vector<9x256xf32> to vector<1x256xf32>
    %39 = vector.broadcast %38 : vector<1x256xf32> to vector<4x256xf32>
    %40 = arith.mulf %37, %39 : vector<4x256xf32>
    %41 = vector.extract_strided_slice %7 {offsets = [0, 15], sizes = [4, 241], strides = [1, 1]} : vector<4x256xf32> to vector<4x241xf32>
    %42 = vector.extract_strided_slice %7 {offsets = [0, 0], sizes = [4, 15], strides = [1, 1]} : vector<4x256xf32> to vector<4x15xf32>
    %43 = tpu.concatenate %41, %42 in 1 : vector<4x241xf32>, vector<4x15xf32> -> vector<4x256xf32>
    %44 = vector.extract_strided_slice %2 {offsets = [6, 0], sizes = [1, 256], strides = [1, 1]} : vector<9x256xf32> to vector<1x256xf32>
    %45 = vector.broadcast %44 : vector<1x256xf32> to vector<4x256xf32>
    %46 = arith.mulf %43, %45 : vector<4x256xf32>
    %47 = vector.extract_strided_slice %7 {offsets = [0, 16], sizes = [4, 240], strides = [1, 1]} : vector<4x256xf32> to vector<4x240xf32>
    %48 = vector.extract_strided_slice %7 {offsets = [0, 0], sizes = [4, 16], strides = [1, 1]} : vector<4x256xf32> to vector<4x16xf32>
    %49 = tpu.concatenate %47, %48 in 1 : vector<4x240xf32>, vector<4x16xf32> -> vector<4x256xf32>
    %50 = vector.extract_strided_slice %2 {offsets = [7, 0], sizes = [1, 256], strides = [1, 1]} : vector<9x256xf32> to vector<1x256xf32>
    %51 = vector.broadcast %50 : vector<1x256xf32> to vector<4x256xf32>
    %52 = arith.mulf %49, %51 : vector<4x256xf32>
    %53 = vector.extract_strided_slice %7 {offsets = [0, 17], sizes = [4, 239], strides = [1, 1]} : vector<4x256xf32> to vector<4x239xf32>
    %54 = vector.extract_strided_slice %7 {offsets = [0, 0], sizes = [4, 17], strides = [1, 1]} : vector<4x256xf32> to vector<4x17xf32>
    %55 = tpu.concatenate %53, %54 in 1 : vector<4x239xf32>, vector<4x17xf32> -> vector<4x256xf32>
    %56 = vector.extract_strided_slice %2 {offsets = [8, 0], sizes = [1, 256], strides = [1, 1]} : vector<9x256xf32> to vector<1x256xf32>
    %57 = vector.broadcast %56 : vector<1x256xf32> to vector<4x256xf32>
    %58 = arith.mulf %55, %57 : vector<4x256xf32>
    %59 = tpu.concatenate %13, %19, %25, %31, %34, %40, %46, %52, %58 in 0 : vector<4x256xf32>, vector<4x256xf32>, vector<4x256xf32>, vector<4x256xf32>, vector<4x256xf32>, vector<4x256xf32>, vector<4x256xf32>, vector<4x256xf32>, vector<4x256xf32> -> vector<36x256xf32>
    %c0_5 = arith.constant 0 : index
    %c0_6 = arith.constant 0 : index
    %60 = vector.load %arg2[%c0_5, %c0_6] : memref<8x36xf32, #tpu.memory_space<vmem>>, vector<8x36xf32>
    %cst_7 = arith.constant dense<0.000000e+00> : vector<8x256xf32>
    %61 = tpu.matmul %60, %59, %cst_7 {dimension_numbers = #tpu.dot_dimension_numbers<[1], [0], [0], [1], [0, 0, 1, 1], [], []>, precision = #tpu.contract_precision<fp32>} : vector<8x36xf32>, vector<36x256xf32>, vector<8x256xf32> -> vector<8x256xf32>
    %cst_8 = arith.constant 0.000000e+00 : f32
    %62 = vector.broadcast %cst_8 : f32 to vector<8x256xf32>
    %63 = arith.cmpf oge, %61, %62 : vector<8x256xf32>
    %cst_9 = arith.constant 2.000000e-01 : f32
    %64 = vector.broadcast %cst_9 : f32 to vector<8x256xf32>
    %65 = arith.mulf %64, %61 : vector<8x256xf32>
    %66 = arith.select %63, %61, %65 : vector<8x256xi1>, vector<8x256xf32>
    %67 = vector.extract_strided_slice %66 {offsets = [0, 239], sizes = [8, 17], strides = [1, 1]} : vector<8x256xf32> to vector<8x17xf32>
    %68 = vector.extract_strided_slice %66 {offsets = [0, 0], sizes = [8, 239], strides = [1, 1]} : vector<8x256xf32> to vector<8x239xf32>
    %69 = tpu.concatenate %67, %68 in 1 : vector<8x17xf32>, vector<8x239xf32> -> vector<8x256xf32>
    %70 = vector.extract_strided_slice %2 {offsets = [0, 0], sizes = [1, 256], strides = [1, 1]} : vector<9x256xf32> to vector<1x256xf32>
    %71 = vector.broadcast %70 : vector<1x256xf32> to vector<8x256xf32>
    %72 = arith.mulf %69, %71 : vector<8x256xf32>
    %73 = vector.extract_strided_slice %66 {offsets = [0, 240], sizes = [8, 16], strides = [1, 1]} : vector<8x256xf32> to vector<8x16xf32>
    %74 = vector.extract_strided_slice %66 {offsets = [0, 0], sizes = [8, 240], strides = [1, 1]} : vector<8x256xf32> to vector<8x240xf32>
    %75 = tpu.concatenate %73, %74 in 1 : vector<8x16xf32>, vector<8x240xf32> -> vector<8x256xf32>
    %76 = vector.extract_strided_slice %2 {offsets = [1, 0], sizes = [1, 256], strides = [1, 1]} : vector<9x256xf32> to vector<1x256xf32>
    %77 = vector.broadcast %76 : vector<1x256xf32> to vector<8x256xf32>
    %78 = arith.mulf %75, %77 : vector<8x256xf32>
    %79 = vector.extract_strided_slice %66 {offsets = [0, 241], sizes = [8, 15], strides = [1, 1]} : vector<8x256xf32> to vector<8x15xf32>
    %80 = vector.extract_strided_slice %66 {offsets = [0, 0], sizes = [8, 241], strides = [1, 1]} : vector<8x256xf32> to vector<8x241xf32>
    %81 = tpu.concatenate %79, %80 in 1 : vector<8x15xf32>, vector<8x241xf32> -> vector<8x256xf32>
    %82 = vector.extract_strided_slice %2 {offsets = [2, 0], sizes = [1, 256], strides = [1, 1]} : vector<9x256xf32> to vector<1x256xf32>
    %83 = vector.broadcast %82 : vector<1x256xf32> to vector<8x256xf32>
    %84 = arith.mulf %81, %83 : vector<8x256xf32>
    %85 = vector.extract_strided_slice %66 {offsets = [0, 255], sizes = [8, 1], strides = [1, 1]} : vector<8x256xf32> to vector<8x1xf32>
    %86 = vector.extract_strided_slice %66 {offsets = [0, 0], sizes = [8, 255], strides = [1, 1]} : vector<8x256xf32> to vector<8x255xf32>
    %87 = tpu.concatenate %85, %86 in 1 : vector<8x1xf32>, vector<8x255xf32> -> vector<8x256xf32>
    %88 = vector.extract_strided_slice %2 {offsets = [3, 0], sizes = [1, 256], strides = [1, 1]} : vector<9x256xf32> to vector<1x256xf32>
    %89 = vector.broadcast %88 : vector<1x256xf32> to vector<8x256xf32>
    %90 = arith.mulf %87, %89 : vector<8x256xf32>
    %91 = vector.extract_strided_slice %2 {offsets = [4, 0], sizes = [1, 256], strides = [1, 1]} : vector<9x256xf32> to vector<1x256xf32>
    %92 = vector.broadcast %91 : vector<1x256xf32> to vector<8x256xf32>
    %93 = arith.mulf %66, %92 : vector<8x256xf32>
    %94 = vector.extract_strided_slice %66 {offsets = [0, 1], sizes = [8, 255], strides = [1, 1]} : vector<8x256xf32> to vector<8x255xf32>
    %95 = vector.extract_strided_slice %66 {offsets = [0, 0], sizes = [8, 1], strides = [1, 1]} : vector<8x256xf32> to vector<8x1xf32>
    %96 = tpu.concatenate %94, %95 in 1 : vector<8x255xf32>, vector<8x1xf32> -> vector<8x256xf32>
    %97 = vector.extract_strided_slice %2 {offsets = [5, 0], sizes = [1, 256], strides = [1, 1]} : vector<9x256xf32> to vector<1x256xf32>
    %98 = vector.broadcast %97 : vector<1x256xf32> to vector<8x256xf32>
    %99 = arith.mulf %96, %98 : vector<8x256xf32>
    %100 = vector.extract_strided_slice %66 {offsets = [0, 15], sizes = [8, 241], strides = [1, 1]} : vector<8x256xf32> to vector<8x241xf32>
    %101 = vector.extract_strided_slice %66 {offsets = [0, 0], sizes = [8, 15], strides = [1, 1]} : vector<8x256xf32> to vector<8x15xf32>
    %102 = tpu.concatenate %100, %101 in 1 : vector<8x241xf32>, vector<8x15xf32> -> vector<8x256xf32>
    %103 = vector.extract_strided_slice %2 {offsets = [6, 0], sizes = [1, 256], strides = [1, 1]} : vector<9x256xf32> to vector<1x256xf32>
    %104 = vector.broadcast %103 : vector<1x256xf32> to vector<8x256xf32>
    %105 = arith.mulf %102, %104 : vector<8x256xf32>
    %106 = vector.extract_strided_slice %66 {offsets = [0, 16], sizes = [8, 240], strides = [1, 1]} : vector<8x256xf32> to vector<8x240xf32>
    %107 = vector.extract_strided_slice %66 {offsets = [0, 0], sizes = [8, 16], strides = [1, 1]} : vector<8x256xf32> to vector<8x16xf32>
    %108 = tpu.concatenate %106, %107 in 1 : vector<8x240xf32>, vector<8x16xf32> -> vector<8x256xf32>
    %109 = vector.extract_strided_slice %2 {offsets = [7, 0], sizes = [1, 256], strides = [1, 1]} : vector<9x256xf32> to vector<1x256xf32>
    %110 = vector.broadcast %109 : vector<1x256xf32> to vector<8x256xf32>
    %111 = arith.mulf %108, %110 : vector<8x256xf32>
    %112 = vector.extract_strided_slice %66 {offsets = [0, 17], sizes = [8, 239], strides = [1, 1]} : vector<8x256xf32> to vector<8x239xf32>
    %113 = vector.extract_strided_slice %66 {offsets = [0, 0], sizes = [8, 17], strides = [1, 1]} : vector<8x256xf32> to vector<8x17xf32>
    %114 = tpu.concatenate %112, %113 in 1 : vector<8x239xf32>, vector<8x17xf32> -> vector<8x256xf32>
    %115 = vector.extract_strided_slice %2 {offsets = [8, 0], sizes = [1, 256], strides = [1, 1]} : vector<9x256xf32> to vector<1x256xf32>
    %116 = vector.broadcast %115 : vector<1x256xf32> to vector<8x256xf32>
    %117 = arith.mulf %114, %116 : vector<8x256xf32>
    %118 = tpu.concatenate %72, %78, %84, %90, %93, %99, %105, %111, %117 in 0 : vector<8x256xf32>, vector<8x256xf32>, vector<8x256xf32>, vector<8x256xf32>, vector<8x256xf32>, vector<8x256xf32>, vector<8x256xf32>, vector<8x256xf32>, vector<8x256xf32> -> vector<72x256xf32>
    %c0_10 = arith.constant 0 : index
    %c0_11 = arith.constant 0 : index
    %119 = vector.load %arg3[%c0_10, %c0_11] : memref<8x72xf32, #tpu.memory_space<vmem>>, vector<8x72xf32>
    %cst_12 = arith.constant dense<0.000000e+00> : vector<8x256xf32>
    %120 = tpu.matmul %119, %118, %cst_12 {dimension_numbers = #tpu.dot_dimension_numbers<[1], [0], [0], [1], [0, 0, 1, 1], [], []>, precision = #tpu.contract_precision<fp32>} : vector<8x72xf32>, vector<72x256xf32>, vector<8x256xf32> -> vector<8x256xf32>
    %c0_13 = arith.constant 0 : index
    %c0_14 = arith.constant 0 : index
    %121 = vector.load %arg5[%c0_13, %c0_14] : memref<256x64xf32, #tpu.memory_space<vmem>>, vector<256x64xf32>
    %cst_15 = arith.constant dense<0.000000e+00> : vector<8x64xf32>
    %122 = tpu.matmul %120, %121, %cst_15 {dimension_numbers = #tpu.dot_dimension_numbers<[1], [0], [0], [1], [0, 0, 1, 1], [], []>, precision = #tpu.contract_precision<fp32>} : vector<8x256xf32>, vector<256x64xf32>, vector<8x64xf32> -> vector<8x64xf32>
    %c0_16 = arith.constant 0 : index
    %c0_17 = arith.constant 0 : index
    %123 = vector.load %arg5[%c0_16, %c0_17] : memref<256x64xf32, #tpu.memory_space<vmem>>, vector<256x64xf32>
    %cst_18 = arith.constant dense<0.000000e+00> : vector<4x64xf32>
    %124 = tpu.matmul %1, %123, %cst_18 {dimension_numbers = #tpu.dot_dimension_numbers<[1], [0], [0], [1], [0, 0, 1, 1], [], []>, precision = #tpu.contract_precision<fp32>} : vector<4x256xf32>, vector<256x64xf32>, vector<4x64xf32> -> vector<4x64xf32>
    %c0_19 = arith.constant 0 : index
    %c0_20 = arith.constant 0 : index
    %125 = vector.load %arg4[%c0_19, %c0_20] : memref<8x4xf32, #tpu.memory_space<vmem>>, vector<8x4xf32>
    %cst_21 = arith.constant dense<0.000000e+00> : vector<8x64xf32>
    %126 = tpu.matmul %125, %124, %cst_21 {dimension_numbers = #tpu.dot_dimension_numbers<[1], [0], [0], [1], [0, 0, 1, 1], [], []>, precision = #tpu.contract_precision<fp32>} : vector<8x4xf32>, vector<4x64xf32>, vector<8x64xf32> -> vector<8x64xf32>
    %127 = arith.addf %126, %122 : vector<8x64xf32>
    %c0_22 = arith.constant 0 : index
    %c0_23 = arith.constant 0 : index
    %c0_24 = arith.constant 0 : index
    %128 = vector.load %arg7[%c0_22, %c0_23, %c0_24] : memref<1x8x64xf32, #tpu.memory_space<vmem>>, vector<1x8x64xf32>
    %129 = vector.shape_cast %128 : vector<1x8x64xf32> to vector<8x64xf32>
    %130 = vector.shape_cast %127 : vector<8x64xf32> to vector<1x8x64xf32>
    tpu.vector_store %arg7[%c0_22, %c0_23, %c0_24], %130 {strides = array<i32>} : memref<1x8x64xf32, #tpu.memory_space<vmem>>, vector<1x8x64xf32>,
    return
  }
  func.func @transform_0(%arg0: i32) -> (i32, i32, i32) {
    %c0_i32 = arith.constant 0 : i32
    %c0_i32_0 = arith.constant 0 : i32
    %c0_i32_1 = arith.constant 0 : i32
    return %arg0, %c0_i32, %c0_i32_0 : i32, i32, i32
  }
  func.func @transform_1(%arg0: i32) -> (i32, i32) {
    %c0_i32 = arith.constant 0 : i32
    %c0_i32_0 = arith.constant 0 : i32
    %c0_i32_1 = arith.constant 0 : i32
    return %c0_i32, %c0_i32_0 : i32, i32
  }
  func.func @transform_2(%arg0: i32) -> (i32, i32) {
    %c0_i32 = arith.constant 0 : i32
    %c0_i32_0 = arith.constant 0 : i32
    %c0_i32_1 = arith.constant 0 : i32
    return %c0_i32, %c0_i32_0 : i32, i32
  }
  func.func @transform_3(%arg0: i32) -> (i32, i32) {
    %c0_i32 = arith.constant 0 : i32
    %c0_i32_0 = arith.constant 0 : i32
    %c0_i32_1 = arith.constant 0 : i32
    return %c0_i32, %c0_i32_0 : i32, i32
  }
  func.func @transform_4(%arg0: i32) -> (i32, i32) {
    %c0_i32 = arith.constant 0 : i32
    %c0_i32_0 = arith.constant 0 : i32
    %c0_i32_1 = arith.constant 0 : i32
    return %c0_i32, %c0_i32_0 : i32, i32
  }
  func.func @transform_5(%arg0: i32) -> (i32, i32) {
    %c0_i32 = arith.constant 0 : i32
    %c0_i32_0 = arith.constant 0 : i32
    %c0_i32_1 = arith.constant 0 : i32
    return %c0_i32, %c0_i32_0 : i32, i32
  }
  func.func @transform_6(%arg0: i32) -> (i32, i32, i32) {
    %c0_i32 = arith.constant 0 : i32
    %c0_i32_0 = arith.constant 0 : i32
    %c0_i32_1 = arith.constant 0 : i32
    return %arg0, %c0_i32, %c0_i32_0 : i32, i32, i32
  }
}

</mosaic_0001>

<bundles_post_ra>
// kernel: dblock_forward.1
= control target key start
LH: loop header
LB: loop body
LE: loop exit
PB: predicated region body
PF: predicated region fallthrough
CT: control target
= control target key end

     0   :  { %s4641_s21 = smov 0   ;;  %s6232_s0 = inlined_call_operand.vmem [shape: f32[2,4,256], index: 0, kind: input, shape index: {}]   ;;  %s6233_s1 = inlined_call_operand.vmem [shape: f32[8,36], index: 1, kind: input, shape index: {}]   ;;  %s6234_s2 = inlined_call_operand.vmem [shape: f32[8,72], index: 2, kind: input, shape index: {}]   ;;  %s6235_s3 = inlined_call_operand.vmem [shape: f32[8,4], index: 3, kind: input, shape index: {}]   ;;  %s6236_s4 = inlined_call_operand.vmem [shape: f32[256,64], index: 4, kind: input, shape index: {}]   ;;  %s6237_s5 = inlined_call_operand.vmem [shape: f32[9,256], index: 5, kind: input, shape index: {}]   ;;  %s6238_s6 = inlined_call_operand.vmem [shape: f32[2,8,64], index: 6, kind: output, shape index: {}]  }
   0x1 LB: > { %s4093_s22 = sadd.s32 4294967295, %s4594_s21   ;;  %p4097_p0 = scmp.ge.s32.totalorder %s4594_s21, 1  ;;  %s4594_s21 = sphi %s4641_s21, %s16_s21  }
   0x2   : > { %p212_p1 = scmp.lt.s32.totalorder %s4594_s21, 3 }
   0x4   : > { %p213_p2 = pnand %p4097_p0, %p212_p1 }
   0x6   : > { %216 = sbr.rel (%p213_p2) target bundleno = 1388 (0x56c), region = 44 }
   0xb   : > { %p241_p3 = scmp.lt.s32.totalorder %s4093_s22, 1  ;;  %s4596_s27 = smov 111   ;;  %v6248_v4 = vmov 0.0   ;;  %v270_v5 = vlaneseq  ;;  %v4684_v8 = vld [vmem:[%s6237_s5] sm:$0xff]  ;;  %v4689_v9 = vld [vmem:[%s6237_s5 + $0x8] sm:$0xff]  ;;  %vm417_vm1 = vcmask 908288  }
   0xc   : > { %s4597_s28 = smov 112   ;;  %s4598_s29 = smov 127   ;;  %554 = vmatprep.mubr.f32.mxu0 %v6248_v4  ;;  %680 = vmatprep.mubr.f32.mxu1 %v6248_v4  ;;  %v4704_v17 = vld [vmem:[%s6237_s5 + $0x10] ss:$0 sm:$0xff]  ;;  %v4709_v18 = vld [vmem:[%s6237_s5 + $0x18] ss:$0 sm:$0xff] }
   0xd   : > { %s6625_s22 = smov (!%p241_p3, %s4093_s22), 1  ;;  %s4599_s30 = smov 113   ;;  %v4678_v6 = vshrl.u32 %v270_v5, 7  ;;  %vm460_vm2 = vcmask 1043456   ;;  %vm357_vm3 = vcmask 1039360   ;;  %vm377_vm4 = vcmask 924672  }
   0xe   : > { %s4105_s23 = sshll.u32 %s6625_s22, 3  ;;  %s4600_s7 = smov 1   ;;  %vm397_vm5 = vcmask 916480   ;;  %v469_v28 = vld [vmem:[%s6233_s1] sm:$0xff]  ;;  %vm470_vm6 = vcmask 293888   ;;  %vm325_vm7 = vcmask 7168  }
   0xf   : > { %s4657_s26 = scalar_lea.vmem %s6232_s0, %s4105_s23  ;;  %s4601_s8 = smov 16   ;;  %v342_v7 = vsub.s32 4, %v4678_v6  ;;  %v365_v15 = vsub.s32 5, %v4678_v6  ;;  %v385_v16 = vsub.s32 6, %v4678_v6  ;;  %v405_v20 = vsub.s32 7, %v4678_v6 }
  0x10   : > { %v250_v0 = vld [vmem:[%s4657_s26] sm:$0xff]  ;;  %s4603_s9 = smov 15   ;;  %s4604_s10 = smov 17   ;;  %v332_v32 = vsub.s32 3, %v4678_v6  ;;  %v292_v36 = vsub.s32 1, %v4678_v6  ;;  %v312_v41 = vsub.s32 2, %v4678_v6 }
  0x11   : > { %vm255_vm0 = vcmp.ge.f32.partialorder %v250_v0, 0.0  ;;  %v256_v1 = vmul.f32 0.2, %v250_v0  ;;  %v4692_v10 = vrot.slane %v4684_v8, %v342_v7  ;;  %v4695_v11 = vrot.slane %v4689_v9, %v342_v7 }
  0x12   : > { %v4713_v23 = vrot.slane %v4684_v8, %v365_v15  ;;  %v4716_v24 = vrot.slane %v4689_v9, %v365_v15  ;;  %v4721_v27 = vrot.slane %v4684_v8, %v385_v16  ;;  %v4729_v31 = vrot.slane %v4689_v9, %v385_v16 }
  0x13   : > { %v257_v2 = vsel %vm255_vm0, %v250_v0, %v256_v1  ;;  %v350_v12 = vcombine.low %v4692_v10, %v4695_v11  ;;  %v4733_v34 = vrot.slane %v4684_v8, %v405_v20  ;;  %v4736_v35 = vrot.slane %v4689_v9, %v405_v20 }
  0x14   : > { %413 = vrot.lane.b32.xlu1 %v257_v2, %s4596_s27  ;;  %393 = vrot.lane.b32.xlu0 %v257_v2, %s4597_s28  ;;  %v259_v3 = vcombine.high %v257_v2, %v257_v2  ;;  %v472_v42 = vsel %vm470_vm6, %v469_v28, 0  ;;  %v4751_v49 = vrot.slane %v4684_v8, %v332_v32  ;;  %v4758_v51 = vrot.slane %v4689_v9, %v332_v32 }
  0x15   : > { %v352_v19 = vmul.f32 %v350_v12, %v257_v2  ;;  %vm285_vm8 = vcmask 130048   ;;  %v4765_v57 = vrot.slane %v4684_v8, %v292_v36  ;;  %v4767_v58 = vand.u32 4294901760, %v472_v42 }
  0x16   : > { %v4772_v61 = vrot.slane %v4689_v9, %v292_v36  ;;  %v4775_v62 = vrot.slane %v4684_v8, %v312_v41  ;;  %vm305_vm9 = vcmask 121856   ;;  %v272_v32 = vsub.s32 0, %v4678_v6 }
  0x17   : > { %v446_v33 = vcombine.high %v352_v19, %v352_v19  ;;  %v4793_v20 = vsub.f32 %v472_v42, %v4767_v58  ;;  %vm265_vm10 = vcmask 138240   ;;  %vm1148_vm13 = vcmask 588800  }
  0x18   : > { %353 = vrot.lane.b32.xlu0 %v257_v2, %s4598_s29  ;;  %415 = vrot.lane.b32.xlu1 %v259_v3, %s4596_s27  ;;  %vm4605_vm14 = vmmov 0   ;;  %vm3585_vm15 = vcmask 31744   ;;  %vm4038_vm0 = vcmask 523264  }
  0x1c   : > { %373 = vrot.lane.b32.xlu0 %v257_v2, %s4599_s30  ;;  %355 = vrot.lane.b32.xlu1 %v259_v3, %s4598_s29 }
  0x20   : > { %375 = vrot.lane.b32.xlu1 %v259_v3, %s4599_s30  ;;  %395 = vrot.lane.b32.xlu0 %v259_v3, %s4597_s28 }
  0x24   : > { %323 = vrot.lane.b32.xlu1 %v257_v2, %s4600_s7  ;;  %320 = vrot.lane.b32.xlu0 %v259_v3, %s4600_s7 }
  0x28   : > { %283 = vrot.lane.b32.xlu1 %v257_v2, %s4601_s8  ;;  %280 = vrot.lane.b32.xlu0 %v259_v3, %s4601_s8 }
  0x2c   : > { %303 = vrot.lane.b32.xlu1 %v257_v2, %s4603_s9  ;;  %300 = vrot.lane.b32.xlu0 %v259_v3, %s4603_s9 }
  0x30   : > { %263 = vrot.lane.b32.xlu1 %v257_v2, %s4604_s10  ;;  %260 = vrot.lane.b32.xlu0 %v259_v3, %s4604_s10 }
  0x86   : > { %v414_v13 = vpop.permute.xlu1 %413  ;;  %v394_v14 = vpop.permute.xlu0 %393 }
  0x8a   : > { %v354_v21 = vpop.permute.xlu0 %353  ;;  %v416_v22 = vpop.permute.xlu1 %415 }
  0x8b   : > { %v418_v25 = vsel %vm417_vm1, %v414_v13, %v416_v22  ;;  %v422_v26 = vsel %vm417_vm1, %v416_v22, %v414_v13 }
  0x8c   : > { %v431_v29 = vmul.f32 %v4704_v17, %v418_v25  ;;  %v432_v30 = vmul.f32 %v4709_v18, %v422_v26 }
  0x8e   : > { %v475_v37 = vsel %vm460_vm2, %v431_v29, 0  ;;  %v478_v38 = vsel %vm460_vm2, %v432_v30, 0  ;;  %v374_v39 = vpop.permute.xlu0 %373  ;;  %v356_v40 = vpop.permute.xlu1 %355 }
  0x8f   : > { %v4742_v43 = vand.u32 4294901760, %v478_v38  ;;  %v4744_v44 = vand.u32 4294901760, %v475_v37  ;;  %v358_v45 = vsel %vm357_vm3, %v354_v21, %v356_v40  ;;  %v362_v46 = vsel %vm357_vm3, %v356_v40, %v354_v21 }
  0x90   : > { %v371_v47 = vmul.f32 %v4713_v23, %v358_v45  ;;  %v372_v48 = vmul.f32 %v4716_v24, %v362_v46  ;;  %v557_v46 = vand.u32 4294901760, %v4793_v20 }
  0x91   : > { %v4754_v50 = vsub.f32 %v475_v37, %v4744_v44  ;;  %503 = vmatprep.subr.mxu0 %v4742_v43  ;;  %v4761_v52 = vsub.f32 %v478_v38, %v4742_v43 }
  0x92   : > { %v450_v53 = vrot.slane %v371_v47, 4  ;;  %v451_v54 = vrot.slane %v372_v48, 4  ;;  %505 = vmatpush1.msra.mxu0 %v4744_v44  ;;  %v376_v55 = vpop.permute.xlu1 %375  ;;  %v396_v56 = vpop.permute.xlu0 %395 }
  0x93   : > { %v398_v59 = vsel %vm397_vm5, %v394_v14, %v396_v56  ;;  %v402_v60 = vsel %vm397_vm5, %v396_v56, %v394_v14  ;;  %v378_v1 = vsel %vm377_vm4, %v374_v39, %v376_v55  ;;  %v382_v2 = vsel %vm377_vm4, %v376_v55, %v374_v39 }
  0x94   : > { %v465_v63 = vsel %vm460_vm2, %v352_v19, %v450_v53  ;;  %v466_v0 = vsel %vm460_vm2, %v446_v33, %v451_v54  ;;  %v411_v3 = vmul.f32 %v4733_v34, %v398_v59  ;;  %v412_v5 = vmul.f32 %v4736_v35, %v402_v60 }
  0x95   : > { %v590_v7 = vand.u32 4294901760, %v4761_v52  ;;  %v596_v12 = vand.u32 4294901760, %v4754_v50  ;;  %v4785_v15 = vand.u32 4294901760, %v466_v0  ;;  %v4787_v16 = vand.u32 4294901760, %v465_v63 }
  0x96   : > { %v324_v13 = vpop.permute.xlu1 %323  ;;  %v321_v14 = vpop.permute.xlu0 %320  ;;  %v4790_v19 = vrot.slane %v4689_v9, %v312_v41  ;;  %v391_v21 = vmul.f32 %v4721_v27, %v378_v1  ;;  %v392_v22 = vmul.f32 %v4729_v31, %v382_v2  ;;  %v456_v25 = vrot.slane %v411_v3, 4 }
  0x97   : > { %v457_v26 = vrot.slane %v412_v5, 4  ;;  %v326_v28 = vsel %vm325_vm7, %v324_v13, %v321_v14  ;;  %v591_v29 = vsub.f32 %v4761_v52, %v590_v7  ;;  %v597_v30 = vsub.f32 %v4754_v50, %v596_v12 }
  0x98   : > { %v467_v33 = vsel %vm460_vm2, %v391_v21, %v456_v25  ;;  %v329_v37 = vsel %vm325_vm7, %v321_v14, %v324_v13  ;;  %v4809_v38 = vsub.f32 %v466_v0, %v4785_v15  ;;  %v4812_v45 = vsub.f32 %v465_v63, %v4787_v16 }
  0x99   : > { %v468_v36 = vsel %vm460_vm2, %v392_v22, %v457_v26  ;;  %v592_v39 = vand.u32 4294901760, %v591_v29  ;;  %v598_v40 = vand.u32 4294901760, %v597_v30  ;;  %v4819_v53 = vand.u32 4294901760, %v467_v33 }
  0x9a   : > { %v284_v41 = vpop.permute.xlu1 %283  ;;  %v281_v42 = vpop.permute.xlu0 %280  ;;  %v4817_v48 = vand.u32 4294901760, %v468_v36  ;;  %v338_v54 = vmul.f32 %v4751_v49, %v329_v37  ;;  %v339_v55 = vmul.f32 %v4758_v51, %v326_v28  ;;  %v4824_v56 = vrot.slane %v4684_v8, %v272_v32 }
  0x9b   : > { %v286_v6 = vsel %vm285_vm8, %v284_v41, %v281_v42  ;;  %v289_v47 = vsel %vm285_vm8, %v281_v42, %v284_v41  ;;  %593 = vmatprep.subr.mxu1 %v592_v39  ;;  %v4832_v63 = vsub.f32 %v467_v33, %v4819_v53  ;;  %v614_v0 = vand.u32 4294901760, %v4809_v38 }
  0x9c   : > { %599 = vmatpush1.msra.mxu1 %v598_v40  ;;  %v298_v59 = vmul.f32 %v4765_v57, %v289_v47  ;;  %507 = vmatprep.subr.mxu0 %v4817_v48  ;;  %v4829_v60 = vsub.f32 %v468_v36, %v4817_v48  ;;  %v299_v1 = vmul.f32 %v4772_v61, %v286_v6  ;;  %v620_v5 = vand.u32 4294901760, %v4812_v45 }
  0x9d   : > { %509 = vmatpush1.msra.mxu0 %v4819_v53  ;;  %v4838_v3 = vrot.slane %v4689_v9, %v272_v32  ;;  %v558_v13 = vsub.f32 %v4793_v20, %v557_v46  ;;  %v608_v25 = vand.u32 4294901760, %v4832_v63  ;;  %v441_v26 = vrot.slane %v338_v54, 4 }
  0x9e   : > { %v304_v2 = vpop.permute.xlu1 %303  ;;  %v301_v8 = vpop.permute.xlu0 %300  ;;  %511 = vmatprep.subr.mxu0 %v4785_v15  ;;  %v602_v22 = vand.u32 4294901760, %v4829_v60  ;;  %v442_v28 = vrot.slane %v339_v55, 4  ;;  %v435_v30 = vrot.slane %v298_v59, 4  ;;  %v615_v36 = vsub.f32 %v4809_v38, %v614_v0 }
  0x9f   : > { %v306_v14 = vsel %vm305_vm9, %v304_v2, %v301_v8  ;;  %v309_v21 = vsel %vm305_vm9, %v301_v8, %v304_v2  ;;  %513 = vmatpush1.msra.mxu0 %v4787_v16  ;;  %v609_v33 = vsub.f32 %v4832_v63, %v608_v25  ;;  %v436_v37 = vrot.slane %v299_v1, 4 }
  0xa0   : > { %v318_v9 = vmul.f32 %v4775_v62, %v309_v21  ;;  %v319_v29 = vmul.f32 %v4790_v19, %v306_v14  ;;  %v603_v32 = vsub.f32 %v4829_v60, %v602_v22  ;;  %v621_v6 = vsub.f32 %v4812_v45, %v620_v5 }
  0xa1   : > { %v610_v59 = vand.u32 4294901760, %v609_v33  ;;  %v616_v21 = vand.u32 4294901760, %v615_v36 }
  0xa2   : > { %v463_v39 = vsel %vm460_vm2, %v318_v9, %v441_v26  ;;  %v464_v40 = vsel %vm460_vm2, %v319_v29, %v442_v28  ;;  %v264_v41 = vpop.permute.xlu1 %263  ;;  %v261_v42 = vpop.permute.xlu0 %260  ;;  %v604_v55 = vand.u32 4294901760, %v603_v32  ;;  %v622_v9 = vand.u32 4294901760, %v621_v6 }
  0xa3   : > { %v266_v47 = vsel %vm265_vm10, %v264_v41, %v261_v42  ;;  %v269_v54 = vsel %vm265_vm10, %v261_v42, %v264_v41  ;;  %v4870_v8 = vand.u32 4294901760, %v464_v40  ;;  %v4872_v14 = vand.u32 4294901760, %v463_v39 }
  0xa4   : > { %v278_v2 = vmul.f32 %v4824_v56, %v269_v54  ;;  %v279_v1 = vmul.f32 %v4838_v3, %v266_v47  ;;  %605 = vmatprep.subr.mxu1 %v604_v55  ;;  %v559_v41 = vand.u32 4294901760, %v558_v13 }
  0xa5   : > { %611 = vmatpush1.msra.mxu1 %v610_v59  ;;  %515 = vmatprep.subr.mxu0 %v4870_v8  ;;  %v625_v29 = vsub.f32 %v464_v40, %v4870_v8  ;;  %v631_v36 = vsub.f32 %v463_v39, %v4872_v14 }
  0xa6   : > { %v461_v26 = vsel %vm460_vm2, %v278_v2, %v435_v30  ;;  %v462_v28 = vsel %vm460_vm2, %v279_v1, %v436_v37  ;;  %617 = vmatprep.subr.mxu1 %v616_v21  ;;  %517 = vmatpush1.msra.mxu0 %v4872_v14 }
  0xa7   : > { %v4879_v32 = vand.u32 4294901760, %v462_v28  ;;  %v4881_v33 = vand.u32 4294901760, %v461_v26  ;;  %623 = vmatpush1.msra.mxu1 %v622_v9  ;;  %v626_v30 = vand.u32 4294901760, %v625_v29  ;;  %v632_v37 = vand.u32 4294901760, %v631_v36 }
  0xa9   : > { %519 = vmatprep.subr.mxu0 %v4879_v32  ;;  %v637_v42 = vsub.f32 %v462_v28, %v4879_v32  ;;  %v643_v6 = vsub.f32 %v461_v26, %v4881_v33  ;;  %v627_v40 = vsub.f32 %v625_v29, %v626_v30  ;;  %v633_v47 = vsub.f32 %v631_v36, %v632_v37 }
  0xaa   : > { %521 = vmatpush1.msra.mxu0 %v4881_v33 }
  0xab   : > { %712 = vmatprep.subr.mxu0 %v4761_v52  ;;  %560 = vmatmul.mubr.f32.vlgmr.msra.gmra.mxu0 %v559_v41  ;;  %v638_v54 = vand.u32 4294901760, %v637_v42  ;;  %v644_v13 = vand.u32 4294901760, %v643_v6  ;;  %v628_v39 = vand.u32 4294901760, %v627_v40  ;;  %v634_v55 = vand.u32 4294901760, %v633_v47 }
  0xac   : > { %715 = vmatpush1.msra.mxu0 %v4754_v50  ;;  %772 = vmatprep.mubr.f32.mxu0 %v6248_v4 }
  0xad   : > { %718 = vmatprep.subr.mxu0 %v4829_v60  ;;  %v639_v59 = vsub.f32 %v637_v42, %v638_v54  ;;  %v645_v2 = vsub.f32 %v643_v6, %v644_v13  ;;  %629 = vmatprep.subr.mxu1 %v628_v39 }
  0xae   : > { %721 = vmatpush1.msra.mxu0 %v4832_v63  ;;  %635 = vmatpush1.msra.mxu1 %v634_v55 }
  0xaf   : > { %724 = vmatprep.subr.mxu0 %v4809_v38  ;;  %v640_v1 = vand.u32 4294901760, %v639_v59  ;;  %v646_v21 = vand.u32 4294901760, %v645_v2 }
  0xb0   : > { %727 = vmatpush1.msra.mxu0 %v4812_v45 }
  0xb1   : > { %641 = vmatprep.subr.mxu1 %v640_v1  ;;  %730 = vmatprep.subr.mxu0 %v625_v29  ;;  %v1147_v29 = vld [vmem:[%s6234_s2] sm:$0xff] }
  0xb2   : > { %647 = vmatpush1.msra.mxu1 %v646_v21  ;;  %733 = vmatpush1.msra.mxu0 %v631_v36  ;;  %v1150_v36 = vsel %vm1148_vm13, %v1147_v29, 0 }
  0xb3   : > { %682 = vmatmul.mubr.f32.vlgmr.msra.gmra.mxu1 %v4767_v58  ;;  %736 = vmatprep.subr.mxu0 %v637_v42  ;;  %v4961_v42 = vand.u32 4294901760, %v1150_v36 }
  0xb4   : > { %804 = vmatprep.subr.mxu1 %v4742_v43  ;;  %739 = vmatpush1.msra.mxu0 %v643_v6 }
  0xb5   : > { %806 = vmatpush1.msra.mxu1 %v4744_v44  ;;  %775 = vmatmul.mubr.f32.vlgmr.msra.gmra.mxu0 %v4793_v20 }
  0xb6   : > { %808 = vmatprep.subr.mxu1 %v4817_v48  ;;  %890 = vmatprep.subr.mxu0 %v590_v7 }
  0xb7   : > { %810 = vmatpush1.msra.mxu1 %v4819_v53  ;;  %894 = vmatpush1.msra.mxu0 %v596_v12 }
  0xb8   : > { %812 = vmatprep.subr.mxu1 %v4785_v15  ;;  %898 = vmatprep.subr.mxu0 %v602_v22 }
  0xb9   : > { %814 = vmatpush1.msra.mxu1 %v4787_v16  ;;  %902 = vmatpush1.msra.mxu0 %v608_v25 }
  0xba   : > { %816 = vmatprep.subr.mxu1 %v4870_v8  ;;  %906 = vmatprep.subr.mxu0 %v614_v0 }
  0xbb   : > { %818 = vmatpush1.msra.mxu1 %v4872_v14  ;;  %910 = vmatpush1.msra.mxu0 %v620_v5 }
  0xbc   : > { %820 = vmatprep.subr.mxu1 %v4879_v32  ;;  %914 = vmatprep.subr.mxu0 %v626_v30 }
  0xbd   : > { %822 = vmatpush1.msra.mxu1 %v4881_v33  ;;  %855 = vmatprep.mubr.f32.mxu1 %v6248_v4 }
  0xbe   : > { %918 = vmatpush1.msra.mxu0 %v632_v37  ;;  %859 = vmatmul.mubr.f32.vlgmr.msra.gmra.mxu1 %v557_v46 }
  0xbf   : > { %922 = vmatprep.subr.mxu0 %v638_v54  ;;  %990 = vmatprep.subr.mxu1 %v4742_v43 }
  0xc0   : > { %926 = vmatpush1.msra.mxu0 %v644_v13  ;;  %959 = vmatprep.mubr.f32.mxu0 %v6248_v4 }
  0xc1   : > { %992 = vmatpush1.msra.mxu1 %v4744_v44  ;;  %961 = vmatmul.mubr.f32.vlgmr.msra.gmra.mxu0 %v4767_v58 }
  0xc2   : > { %994 = vmatprep.subr.mxu1 %v4817_v48  ;;  %1041 = vmatprep.mubr.f32.mxu1 %v6248_v4 }
  0xc3   : > { %996 = vmatpush1.msra.mxu1 %v4819_v53  ;;  %1234 = vmatprep.mubr.f32.mxu0 %v6248_v4 }
  0xc4   : > { %998 = vmatprep.subr.mxu1 %v4785_v15 }
  0xc5   : > { %1000 = vmatpush1.msra.mxu1 %v4787_v16 }
  0xc6   : > { %1002 = vmatprep.subr.mxu1 %v4870_v8 }
  0xc7   : > { %1004 = vmatpush1.msra.mxu1 %v4872_v14 }
  0xc8   : > { %1006 = vmatprep.subr.mxu1 %v4879_v32 }
  0xc9   : > { %1008 = vmatpush1.msra.mxu1 %v4881_v33 }
  0xca   : > { %1043 = vmatmul.mubr.f32.vlgmr.msra.gmra.mxu1 %v4767_v58 }
  0xcb   : > { %1400 = vmatprep.mubr.f32.mxu1 %v6248_v4 }
 0x16b   : > { %v561_v43 = vpop.f32.mrf.mxu0 }
 0x16d   : > { %v563_v44 = vpop.f32.mrf.mxu0 }
 0x173   : > { %v683_v50 = vpop.f32.mrf.mxu1 }
 0x174   : > { %v684_v12 = vadd.f32 %v683_v50, %v561_v43 }
 0x175   : > { %v685_v52 = vpop.f32.mrf.mxu1  ;;  %v776_v7 = vpop.f32.mrf.mxu0 }
 0x176   : > { %v686_v16 = vadd.f32 %v685_v52, %v563_v44  ;;  %v777_v38 = vadd.f32 %v776_v7, %v684_v12 }
 0x177   : > { %v778_v20 = vpop.f32.mrf.mxu0 }
 0x178   : > { %v779_v48 = vadd.f32 %v778_v20, %v686_v16 }
 0x17e   : > { %v860_v15 = vpop.f32.mrf.mxu1 }
 0x17f   : > { %v861_v53 = vadd.f32 %v860_v15, %v777_v38 }
 0x180   : > { %v862_v45 = vpop.f32.mrf.mxu1 }
 0x181   : > { %v962_v46 = vpop.f32.mrf.mxu0  ;;  %v863_v60 = vadd.f32 %v862_v45, %v779_v48 }
 0x182   : > { %v963_v0 = vadd.f32 %v962_v46, %v861_v53 }
 0x183   : > { %v964_v63 = vpop.f32.mrf.mxu0 }
 0x184   : > { %v965_v5 = vadd.f32 %v964_v63, %v863_v60 }
 0x18a   : > { %v1044_v58 = vpop.f32.mrf.mxu1 }
 0x18b   : > { %v1045_v22 = vadd.f32 %v1044_v58, %v963_v0 }
 0x18c   : > { %v1046_v25 = vpop.f32.mrf.mxu1 }
 0x18d   : > { %vm1049_vm11 = vcmp.ge.f32.partialorder %v1045_v22, 0.0  ;;  %v1051_v8 = vmul.f32 0.2, %v1045_v22  ;;  %v1047_v14 = vadd.f32 %v1046_v25, %v965_v5 }
 0x18f   : > { %v1053_v26 = vsel %vm1049_vm11, %v1045_v22, %v1051_v8  ;;  %v1052_v28 = vmul.f32 0.2, %v1047_v14  ;;  %vm1050_vm12 = vcmp.ge.f32.partialorder %v1047_v14, 0.0 }
 0x190   : > { %1093 = vrot.lane.b32.xlu1 %v1053_v26, %s4600_s7  ;;  %1136 = vrot.lane.b32.xlu0 %v1053_v26, %s4596_s27  ;;  %v1101_v32 = vmul.f32 %v1053_v26, %v4692_v10 }
 0x191   : > { %v1054_v9 = vsel %vm1050_vm12, %v1047_v14, %v1052_v28 }
 0x192   : > { %v1102_v30 = vmul.f32 %v1054_v9, %v4695_v11  ;;  %v4959_v37 = vand.u32 4294901760, %v1101_v32  ;;  %v4973_v11 = vsub.f32 %v1150_v36, %v4961_v42 }
 0x194   : > { %1125 = vrot.lane.b32.xlu0 %v1053_v26, %s4597_s28  ;;  %1138 = vrot.lane.b32.xlu1 %v1054_v9, %s4596_s27  ;;  %v4967_v10 = vand.u32 4294901760, %v1102_v30  ;;  %v4970_v55 = vsub.f32 %v1101_v32, %v4959_v37  ;;  %v6241_v15 = vand.u32 4294901760, %v4973_v11 }
 0x196   : > { %v4992_v7 = vsub.f32 %v1102_v30, %v4967_v10  ;;  %v6239_v12 = vand.u32 4294901760, %v4970_v55  ;;  %v5034_v28 = vsub.f32 %v4973_v11, %v6241_v15 }
 0x198   : > { %1114 = vrot.lane.b32.xlu0 %v1053_v26, %s4599_s30  ;;  %1127 = vrot.lane.b32.xlu1 %v1054_v9, %s4597_s28  ;;  %v6240_v22 = vand.u32 4294901760, %v4992_v7 }
 0x19c   : > { %1103 = vrot.lane.b32.xlu0 %v1053_v26, %s4598_s29  ;;  %1116 = vrot.lane.b32.xlu1 %v1054_v9, %s4599_s30 }
 0x1a0   : > { %1090 = vrot.lane.b32.xlu0 %v1054_v9, %s4600_s7  ;;  %1105 = vrot.lane.b32.xlu1 %v1054_v9, %s4598_s29 }
 0x1a4   : > { %1079 = vrot.lane.b32.xlu0 %v1054_v9, %s4603_s9  ;;  %1082 = vrot.lane.b32.xlu1 %v1053_v26, %s4603_s9 }
 0x1a8   : > { %1068 = vrot.lane.b32.xlu0 %v1054_v9, %s4601_s8  ;;  %1071 = vrot.lane.b32.xlu1 %v1053_v26, %s4601_s8 }
 0x1ac   : > { %1056 = vrot.lane.b32.xlu0 %v1054_v9, %s4604_s10  ;;  %1060 = vrot.lane.b32.xlu1 %v1053_v26, %s4604_s10  ;;  %s249_s10 = scalar_lea.vmem %s6238_s6, %s4105_s23 }
 0x202   : > { %v1094_v33 = vpop.permute.xlu1 %1093  ;;  %v1137_v41 = vpop.permute.xlu0 %1136 }
 0x206   : > { %v1126_v6 = vpop.permute.xlu0 %1125  ;;  %v1139_v40 = vpop.permute.xlu1 %1138 }
 0x207   : > { %v1140_v47 = vsel %vm417_vm1, %v1137_v41, %v1139_v40  ;;  %v1144_v54 = vsel %vm417_vm1, %v1139_v40, %v1137_v41 }
 0x208   : > { %v1145_v13 = vmul.f32 %v4704_v17, %v1140_v47  ;;  %v1146_v39 = vmul.f32 %v4709_v18, %v1144_v54 }
 0x20a   : > { %v4975_v59 = vand.u32 4294901760, %v1146_v39  ;;  %v4977_v2 = vand.u32 4294901760, %v1145_v13  ;;  %v1115_v1 = vpop.permute.xlu0 %1114  ;;  %v1128_v21 = vpop.permute.xlu1 %1127 }
 0x20b   : > { %v1129_v43 = vsel %vm397_vm5, %v1126_v6, %v1128_v21  ;;  %v1133_v17 = vsel %vm397_vm5, %v1128_v21, %v1126_v6 }
 0x20c   : > { %v4982_v18 = vsub.f32 %v1146_v39, %v4975_v59  ;;  %v4985_v44 = vsub.f32 %v1145_v13, %v4977_v2  ;;  %v1134_v50 = vmul.f32 %v1129_v43, %v4733_v34  ;;  %v1135_v52 = vmul.f32 %v1133_v17, %v4736_v35  ;;  %1167 = vmatprep.subr.mxu0 %v4975_v59 }
 0x20d   : > { %1169 = vmatpush1.msra.mxu0 %v4977_v2 }
 0x20e   : > { %v1268_v16 = vand.u32 4294901760, %v4985_v44  ;;  %v4997_v20 = vand.u32 4294901760, %v1135_v52  ;;  %v4999_v38 = vand.u32 4294901760, %v1134_v50  ;;  %v1104_v34 = vpop.permute.xlu0 %1103  ;;  %v1117_v45 = vpop.permute.xlu1 %1116  ;;  %v1262_v35 = vand.u32 4294901760, %v4982_v18 }
 0x20f   : > { %v1118_v46 = vsel %vm377_vm4, %v1115_v1, %v1117_v45  ;;  %v1122_v48 = vsel %vm377_vm4, %v1117_v45, %v1115_v1 }
 0x210   : > { %v5005_v53 = vsub.f32 %v1135_v52, %v4997_v20  ;;  %v5008_v60 = vsub.f32 %v1134_v50, %v4999_v38  ;;  %v1123_v63 = vmul.f32 %v1118_v46, %v4721_v27  ;;  %v1124_v0 = vmul.f32 %v1122_v48, %v4729_v31  ;;  %1171 = vmatprep.subr.mxu0 %v4997_v20 }
 0x211   : > { %1173 = vmatpush1.msra.mxu0 %v4999_v38  ;;  %v1263_v58 = vsub.f32 %v4982_v18, %v1262_v35  ;;  %v1269_v5 = vsub.f32 %v4985_v44, %v1268_v16  ;;  %v5024_v27 = vsub.f32 %v4970_v55, %v6239_v12 }
 0x212   : > { %v5026_v31 = vand.u32 4294901760, %v1124_v0  ;;  %v5028_v25 = vand.u32 4294901760, %v1123_v63  ;;  %v1091_v8 = vpop.permute.xlu0 %1090  ;;  %v1106_v14 = vpop.permute.xlu1 %1105  ;;  %v1274_v26 = vand.u32 4294901760, %v5005_v53  ;;  %v1280_v36 = vand.u32 4294901760, %v5008_v60 }
 0x213   : > { %v1095_v9 = vsel %vm325_vm7, %v1094_v33, %v1091_v8  ;;  %v1098_v29 = vsel %vm325_vm7, %v1091_v8, %v1094_v33  ;;  %v1107_v32 = vsel %vm357_vm3, %v1104_v34, %v1106_v14  ;;  %v1111_v41 = vsel %vm357_vm3, %v1106_v14, %v1104_v34 }
 0x214   : > { %v5042_v30 = vsub.f32 %v1123_v63, %v5028_v25  ;;  %v1099_v6 = vmul.f32 %v1098_v29, %v4751_v49  ;;  %v1100_v40 = vmul.f32 %v1095_v9, %v4758_v51  ;;  %1175 = vmatprep.subr.mxu0 %v5026_v31  ;;  %v1112_v47 = vmul.f32 %v1107_v32, %v4713_v23 }
 0x215   : > { %v1113_v54 = vmul.f32 %v1111_v41, %v4716_v24  ;;  %v1264_v33 = vand.u32 4294901760, %v1263_v58  ;;  %1177 = vmatpush1.msra.mxu0 %v5028_v25  ;;  %v1270_v13 = vand.u32 4294901760, %v1269_v5  ;;  %v5051_v39 = vsub.f32 %v1124_v0, %v5026_v31 }
 0x216   : > { %v5053_v1 = vand.u32 4294901760, %v1100_v40  ;;  %v5055_v21 = vand.u32 4294901760, %v1099_v6  ;;  %v1080_v49 = vpop.permute.xlu0 %1079  ;;  %v1083_v43 = vpop.permute.xlu1 %1082  ;;  %v1275_v51 = vsub.f32 %v5005_v53, %v1274_v26  ;;  %v5062_v24 = vand.u32 4294901760, %v1112_v47 }
 0x217   : > { %v5060_v23 = vand.u32 4294901760, %v1113_v54  ;;  %1265 = vmatprep.subr.mxu1 %v1264_v33  ;;  %v1084_v17 = vsel %vm305_vm9, %v1083_v43, %v1080_v49  ;;  %v1087_v50 = vsel %vm305_vm9, %v1080_v49, %v1083_v43  ;;  %v1292_v52 = vand.u32 4294901760, %v5042_v30 }
 0x218   : > { %v5068_v34 = vsub.f32 %v1099_v6, %v5055_v21  ;;  %1271 = vmatpush1.msra.mxu1 %v1270_v13  ;;  %v1088_v45 = vmul.f32 %v1087_v50, %v4775_v62  ;;  %v1089_v46 = vmul.f32 %v1084_v17, %v4790_v19  ;;  %v5076_v63 = vsub.f32 %v1112_v47, %v5062_v24 }
 0x219   : > { %v5073_v48 = vsub.f32 %v1113_v54, %v5060_v23  ;;  %1179 = vmatprep.subr.mxu0 %v5060_v23  ;;  %v1276_v0 = vand.u32 4294901760, %v1275_v51  ;;  %v1281_v58 = vsub.f32 %v5008_v60, %v1280_v36  ;;  %v5083_v5 = vsub.f32 %v1100_v40, %v5053_v1 }
 0x21a   : > { %v5085_v8 = vand.u32 4294901760, %v1089_v46  ;;  %v5087_v62 = vand.u32 4294901760, %v1088_v45  ;;  %1181 = vmatpush1.msra.mxu0 %v5062_v24  ;;  %v1069_v19 = vpop.permute.xlu0 %1068  ;;  %v1072_v14 = vpop.permute.xlu1 %1071  ;;  %v1286_v9 = vand.u32 4294901760, %v5051_v39  ;;  %v1304_v29 = vand.u32 4294901760, %v5076_v63 }
 0x21b   : > { %1277 = vmatprep.subr.mxu1 %v1276_v0  ;;  %v1282_v32 = vand.u32 4294901760, %v1281_v58  ;;  %v1073_v41 = vsel %vm285_vm8, %v1072_v14, %v1069_v19  ;;  %v1076_v6 = vsel %vm285_vm8, %v1069_v19, %v1072_v14  ;;  %1183 = vmatprep.subr.mxu0 %v4967_v10  ;;  %v6246_v40 = vand.u32 4294901760, %v5068_v34 }
 0x21c   : > { %v5097_v47 = vsub.f32 %v1088_v45, %v5087_v62  ;;  %v1077_v54 = vmul.f32 %v1076_v6, %v4765_v57  ;;  %v1078_v33 = vmul.f32 %v1073_v41, %v4772_v61  ;;  %1185 = vmatpush1.msra.mxu0 %v4959_v37  ;;  %v1287_v13 = vsub.f32 %v5051_v39, %v1286_v9 }
 0x21d   : > { %1283 = vmatpush1.msra.mxu1 %v1282_v32  ;;  %1187 = vmatprep.subr.mxu0 %v5053_v1  ;;  %v1293_v49 = vsub.f32 %v5042_v30, %v1292_v52  ;;  %v1298_v43 = vand.u32 4294901760, %v5073_v48  ;;  %v1305_v57 = vsub.f32 %v5076_v63, %v1304_v29  ;;  %v5114_v61 = vsub.f32 %v1089_v46, %v5085_v8 }
 0x21e   : > { %v5116_v51 = vand.u32 4294901760, %v1078_v33  ;;  %v5118_v17 = vand.u32 4294901760, %v1077_v54  ;;  %1189 = vmatpush1.msra.mxu0 %v5055_v21  ;;  %v1057_v50 = vpop.permute.xlu0 %1056  ;;  %v1061_v45 = vpop.permute.xlu1 %1060  ;;  %v6242_v0 = vand.u32 4294901760, %v5083_v5  ;;  %v1288_v58 = vand.u32 4294901760, %v1287_v13 }
 0x21f   : > { %v1294_v19 = vand.u32 4294901760, %v1293_v49  ;;  %v1062_v14 = vsel %vm265_vm10, %v1061_v45, %v1057_v50  ;;  %v1065_v32 = vsel %vm265_vm10, %v1057_v50, %v1061_v45  ;;  %1191 = vmatprep.subr.mxu0 %v5085_v8  ;;  %v6244_v13 = vand.u32 4294901760, %v5097_v47 }
 0x220   : > { %v5126_v46 = vsub.f32 %v1078_v33, %v5116_v51  ;;  %v5129_v41 = vsub.f32 %v1077_v54, %v5118_v17  ;;  %v1066_v6 = vmul.f32 %v1065_v32, %v4824_v56  ;;  %v1067_v12 = vmul.f32 %v1062_v14, %v4838_v3  ;;  %1193 = vmatpush1.msra.mxu0 %v5087_v62 }
 0x221   : > { %1289 = vmatprep.subr.mxu1 %v1288_v58  ;;  %1195 = vmatprep.subr.mxu0 %v5116_v51  ;;  %v1299_v49 = vsub.f32 %v5073_v48, %v1298_v43  ;;  %v1306_v33 = vand.u32 4294901760, %v1305_v57  ;;  %v1311_v54 = vsub.f32 %v4992_v7, %v6240_v22  ;;  %v6243_v45 = vand.u32 4294901760, %v5114_v61 }
 0x222   : > { %v6247_v56 = vand.u32 4294901760, %v5129_v41  ;;  %1295 = vmatpush1.msra.mxu1 %v1294_v19  ;;  %v5143_v3 = vand.u32 4294901760, %v1067_v12  ;;  %v5145_v50 = vand.u32 4294901760, %v1066_v6  ;;  %1197 = vmatpush1.msra.mxu0 %v5118_v17  ;;  %v1323_v57 = vsub.f32 %v5083_v5, %v6242_v0 }
 0x223   : > { %v1300_v58 = vand.u32 4294901760, %v1299_v49  ;;  %v1239_v14 = vand.u32 4294901760, %v5034_v28  ;;  %v1329_v22 = vsub.f32 %v5068_v34, %v6246_v40  ;;  %v6245_v49 = vand.u32 4294901760, %v5126_v46 }
 0x224   : > { %v5154_v32 = vsub.f32 %v1067_v12, %v5143_v3  ;;  %v5157_v19 = vsub.f32 %v1066_v6, %v5145_v50  ;;  %1199 = vmatprep.subr.mxu0 %v5143_v3  ;;  %v1312_v15 = vand.u32 4294901760, %v1311_v54  ;;  %v1318_v0 = vand.u32 4294901760, %v5024_v27 }
 0x225   : > { %1301 = vmatprep.subr.mxu1 %v1300_v58  ;;  %1201 = vmatpush1.msra.mxu0 %v5145_v50  ;;  %v1335_v12 = vsub.f32 %v5114_v61, %v6243_v45  ;;  %v1341_v28 = vsub.f32 %v5097_v47, %v6244_v13  ;;  %v1347_v54 = vsub.f32 %v5126_v46, %v6245_v49  ;;  %v1324_v45 = vand.u32 4294901760, %v1323_v57 }
 0x226   : > { %v1364_v6 = vand.u32 4294901760, %v5157_v19  ;;  %1307 = vmatpush1.msra.mxu1 %v1306_v33  ;;  %1424 = vmatprep.subr.mxu0 %v4982_v18  ;;  %v1353_v27 = vsub.f32 %v5129_v41, %v6247_v56  ;;  %v1358_v58 = vand.u32 4294901760, %v5154_v32  ;;  %v1330_v13 = vand.u32 4294901760, %v1329_v22 }
 0x227   : > { %1313 = vmatprep.subr.mxu1 %v1312_v15  ;;  %1240 = vmatmul.mubr.f32.vlgmr.msra.gmra.mxu0 %v1239_v14  ;;  %v1336_v40 = vand.u32 4294901760, %v1335_v12  ;;  %v1348_v56 = vand.u32 4294901760, %v1347_v54  ;;  %v1342_v15 = vand.u32 4294901760, %v1341_v28  ;;  %v6394_v18 = vand.u32 4294901760, %v4973_v11  ;;  %v1835_v12 = vld [vmem:[%s6236_s4 + $0x50] sm:$0xff] }
 0x228   : > { %1319 = vmatpush1.msra.mxu1 %v1318_v0  ;;  %1427 = vmatpush1.msra.mxu0 %v4985_v44  ;;  %v1359_v33 = vsub.f32 %v5154_v32, %v1358_v58  ;;  %v1365_v49 = vsub.f32 %v5157_v19, %v1364_v6  ;;  %v1354_v57 = vand.u32 4294901760, %v1353_v27  ;;  %v6395_v44 = vand.u32 4294901760, %v4992_v7 }
 0x229   : > { %1325 = vmatprep.subr.mxu1 %v1324_v45  ;;  %1430 = vmatprep.subr.mxu0 %v5005_v53  ;;  %v6398_v53 = vand.u32 4294901760, %v5068_v34  ;;  %v1851_v45 = vld [vmem:[%s6236_s4 + $0xd0] sm:$0xff] }
 0x22a   : > { %1331 = vmatpush1.msra.mxu1 %v1330_v13  ;;  %1433 = vmatpush1.msra.mxu0 %v5008_v60  ;;  %v1360_v22 = vand.u32 4294901760, %v1359_v33  ;;  %v1366_v0 = vand.u32 4294901760, %v1365_v49 }
 0x22b   : > { %1337 = vmatprep.subr.mxu1 %v1336_v40  ;;  %1436 = vmatprep.subr.mxu0 %v5051_v39 }
 0x22c   : > { %1343 = vmatpush1.msra.mxu1 %v1342_v15  ;;  %1439 = vmatpush1.msra.mxu0 %v5042_v30 }
 0x22d   : > { %1349 = vmatprep.subr.mxu1 %v1348_v56  ;;  %1442 = vmatprep.subr.mxu0 %v5073_v48 }
 0x22e   : > { %1355 = vmatpush1.msra.mxu1 %v1354_v57  ;;  %1445 = vmatpush1.msra.mxu0 %v5076_v63 }
 0x22f   : > { %1361 = vmatprep.subr.mxu1 %v1360_v22  ;;  %1448 = vmatprep.subr.mxu0 %v4992_v7  ;;  %v1840_v7 = vld [vmem:[%s6236_s4 + $0x78] sm:$0xff]  ;;  %v5431_v22 = vand.u32 4294901760, %v1851_v45 }
 0x230   : > { %1367 = vmatpush1.msra.mxu1 %v1366_v0  ;;  %1451 = vmatpush1.msra.mxu0 %v4970_v55  ;;  %v1834_v0 = vld [vmem:[%s6236_s4 + $0x48] sm:$0xff] }
 0x231   : > { %1402 = vmatmul.mubr.f32.vlgmr.msra.gmra.mxu1 %v4961_v42  ;;  %1532 = vmatprep.subr.mxu1 %v4975_v59 }
 0x232   : > { %1534 = vmatpush1.msra.mxu1 %v4977_v2  ;;  %1454 = vmatprep.subr.mxu0 %v5083_v5 }
 0x233   : > { %1536 = vmatprep.subr.mxu1 %v4997_v20  ;;  %1457 = vmatpush1.msra.mxu0 %v5068_v34  ;;  %v1853_v34 = vld [vmem:[%s6236_s4 + $0xe0] sm:$0xff] }
 0x234   : > { %1538 = vmatpush1.msra.mxu1 %v4999_v38  ;;  %1460 = vmatprep.subr.mxu0 %v5114_v61 }
 0x235   : > { %1540 = vmatprep.subr.mxu1 %v5026_v31  ;;  %1463 = vmatpush1.msra.mxu0 %v5097_v47 }
 0x236   : > { %1542 = vmatpush1.msra.mxu1 %v5028_v25  ;;  %1466 = vmatprep.subr.mxu0 %v5126_v46 }
 0x237   : > { %1544 = vmatprep.subr.mxu1 %v5060_v23  ;;  %1469 = vmatpush1.msra.mxu0 %v5129_v41 }
 0x238   : > { %1546 = vmatpush1.msra.mxu1 %v5062_v24  ;;  %1472 = vmatprep.subr.mxu0 %v5154_v32 }
 0x239   : > { %1548 = vmatprep.subr.mxu1 %v4967_v10  ;;  %1475 = vmatpush1.msra.mxu0 %v5157_v19 }
 0x23a   : > { %1508 = vmatprep.mubr.f32.mxu0 %v6248_v4  ;;  %1550 = vmatpush1.msra.mxu1 %v4959_v37 }
 0x23b   : > { %1511 = vmatmul.mubr.f32.vlgmr.msra.gmra.mxu0 %v4973_v11  ;;  %1552 = vmatprep.subr.mxu1 %v5053_v1  ;;  %v6399_v11 = vand.u32 4294901760, %v5114_v61 }
 0x23c   : > { %1626 = vmatprep.subr.mxu0 %v1262_v35  ;;  %1554 = vmatpush1.msra.mxu1 %v5055_v21  ;;  %v6397_v35 = vand.u32 4294901760, %v5083_v5 }
 0x23d   : > { %1630 = vmatpush1.msra.mxu0 %v1268_v16  ;;  %1556 = vmatprep.subr.mxu1 %v5085_v8  ;;  %v6396_v16 = vand.u32 4294901760, %v4970_v55  ;;  %v6400_v55 = vand.u32 4294901760, %v5097_v47 }
 0x23e   : > { %1634 = vmatprep.subr.mxu0 %v1274_v26  ;;  %1558 = vmatpush1.msra.mxu1 %v5087_v62 }
 0x23f   : > { %1638 = vmatpush1.msra.mxu0 %v1280_v36  ;;  %1560 = vmatprep.subr.mxu1 %v5116_v51  ;;  %v1854_v36 = vld [vmem:[%s6236_s4 + $0xe8] sm:$0xff] }
 0x240   : > { %1642 = vmatprep.subr.mxu0 %v1286_v9  ;;  %1562 = vmatpush1.msra.mxu1 %v5118_v17 }
 0x241   : > { %1646 = vmatpush1.msra.mxu0 %v1292_v52  ;;  %1564 = vmatprep.subr.mxu1 %v5143_v3 }
 0x242   : > { %1650 = vmatprep.subr.mxu0 %v1298_v43  ;;  %1566 = vmatpush1.msra.mxu1 %v5145_v50  ;;  %v1852_v43 = vld [vmem:[%s6236_s4 + $0xd8] sm:$0xff] }
 0x243   : > { %1599 = vmatprep.mubr.f32.mxu1 %v6248_v4  ;;  %1654 = vmatpush1.msra.mxu0 %v1304_v29  ;;  %v5405_v49 = vand.u32 4294901760, %v1852_v43 }
 0x244   : > { %1603 = vmatmul.mubr.f32.vlgmr.msra.gmra.mxu1 %v6394_v18  ;;  %1658 = vmatprep.subr.mxu0 %v6395_v44 }
 0x245   : > { %1750 = vmatprep.subr.mxu1 %v4975_v59  ;;  %1662 = vmatpush1.msra.mxu0 %v6396_v16  ;;  %v6401_v59 = vand.u32 4294901760, %v5126_v46  ;;  %v5429_v57 = vsub.f32 %v1852_v43, %v5405_v49 }
 0x246   : > { %1752 = vmatpush1.msra.mxu1 %v4977_v2  ;;  %1666 = vmatprep.subr.mxu0 %v6397_v35  ;;  %v6402_v2 = vand.u32 4294901760, %v5129_v41  ;;  %v1836_v41 = vld [vmem:[%s6236_s4 + $0x58] sm:$0xff]  ;;  %v5445_v35 = vand.u32 4294901760, %v1835_v12 }
 0x247   : > { %1754 = vmatprep.subr.mxu1 %v4997_v20  ;;  %1670 = vmatpush1.msra.mxu0 %v6398_v53  ;;  %v5294_v20 = vand.u32 4294901760, %v1840_v7  ;;  %v5418_v27 = vand.u32 4294901760, %v1836_v41  ;;  %v1849_v53 = vld [vmem:[%s6236_s4 + $0xc0] sm:$0xff] }
 0x248   : > { %1756 = vmatpush1.msra.mxu1 %v4999_v38  ;;  %1674 = vmatprep.subr.mxu0 %v6399_v11  ;;  %v1855_v38 = vld [vmem:[%s6236_s4 + $0xf0] sm:$0xff] }
 0x249   : > { %1758 = vmatprep.subr.mxu1 %v5026_v31  ;;  %1678 = vmatpush1.msra.mxu0 %v6400_v55  ;;  %v1839_v31 = vld [vmem:[%s6236_s4 + $0x70] sm:$0xff]  ;;  %v5443_v16 = vsub.f32 %v1836_v41, %v5418_v27  ;;  %v5455_v55 = vand.u32 4294901760, %v5429_v57 }
 0x24a   : > { %1760 = vmatpush1.msra.mxu1 %v5028_v25  ;;  %1682 = vmatprep.subr.mxu0 %v6401_v59  ;;  %v5309_v25 = vsub.f32 %v1840_v7, %v5294_v20  ;;  %v5311_v26 = vand.u32 4294901760, %v1839_v31  ;;  %v5458_v59 = vsub.f32 %v1851_v45, %v5431_v22 }
 0x24b   : > { %1762 = vmatprep.subr.mxu1 %v5060_v23  ;;  %1686 = vmatpush1.msra.mxu0 %v6402_v2  ;;  %6420 = vst [vmem:[#allocation19_spill] sm:$0xff] %v5455_v55 }
 0x24c   : > { %1764 = vmatpush1.msra.mxu1 %v5062_v24  ;;  %1690 = vmatprep.subr.mxu0 %v1358_v58  ;;  %v5330_v23 = vand.u32 4294901760, %v5309_v25  ;;  %v5333_v24 = vsub.f32 %v1839_v31, %v5311_v26  ;;  %v1850_v58 = vld [vmem:[%s6236_s4 + $0xc8] sm:$0xff]  ;;  %v5473_v31 = vsub.f32 %v1835_v12, %v5445_v35 }
 0x24d   : > { %1766 = vmatprep.subr.mxu1 %v4967_v10  ;;  %1694 = vmatpush1.msra.mxu0 %v1364_v6  ;;  %v5460_v2 = vand.u32 4294901760, %v1850_v58 }
 0x24e   : > { %1727 = vmatprep.mubr.f32.mxu0 %v6248_v4  ;;  %1768 = vmatpush1.msra.mxu1 %v4959_v37  ;;  %v1856_v37 = vld [vmem:[%s6236_s4 + $0xf8] sm:$0xff]  ;;  %6406 = vst [vmem:[#allocation5_spill] sm:$0xff] %v5330_v23  ;;  %v1973_v9 = vsub.f32 %v5309_v25, %v5330_v23  ;;  %v5358_v29 = vand.u32 4294901760, %v5333_v24  ;;  %v5494_v43 = vand.u32 4294901760, %v5473_v31 }
 0x24f   : > { %1729 = vmatmul.mubr.f32.vlgmr.msra.gmra.mxu0 %v4961_v42  ;;  %1770 = vmatprep.subr.mxu1 %v5053_v1  ;;  %v5289_v10 = vand.u32 4294901760, %v1856_v37  ;;  %v5323_v1 = vand.u32 4294901760, %v1854_v36 }
 0x250   : > { %1772 = vmatpush1.msra.mxu1 %v5055_v21  ;;  %1817 = vmatprep.mubr.f32.mxu1 %v6248_v4  ;;  %v1838_v21 = vld [vmem:[%s6236_s4 + $0x68] sm:$0xff]  ;;  %6408 = vst [vmem:[#allocation7_spill] sm:$0xff] %v5358_v29  ;;  %v5383_v13 = vand.u32 4294901760, %v1973_v9  ;;  %v1980_v56 = vsub.f32 %v5333_v24, %v5358_v29  ;;  %6424 = vst [vmem:[#allocation23_spill] sm:$0xff] %v5494_v43 }
 0x251   : > { %1774 = vmatprep.subr.mxu1 %v5085_v8  ;;  %6403 = vst [vmem:[#allocation2_spill] sm:$0xff] %v5289_v10  ;;  %v5300_v60 = vsub.f32 %v1856_v37, %v5289_v10  ;;  %4106 = vmatprep.subr.mxu0 %v5289_v10  ;;  %v5335_v52 = vand.u32 4294901760, %v1838_v21  ;;  %v5347_v5 = vsub.f32 %v1854_v36, %v5323_v1  ;;  %v5349_v8 = vand.u32 4294901760, %v1853_v34  ;;  %v1833_v37 = vld [vmem:[%s6236_s4 + $0x40] sm:$0xff] }
 0x252   : > { %1776 = vmatpush1.msra.mxu1 %v5087_v62  ;;  %4107 = vmatpush3.msra.mxu0 %v5294_v20  ;;  %v1837_v62 = vld [vmem:[%s6236_s4 + $0x60] sm:$0xff]  ;;  %6411 = vst [vmem:[#allocation10_spill] sm:$0xff] %v5383_v13  ;;  %v5411_v28 = vand.u32 4294901760, %v1980_v56  ;;  %v5475_v36 = vand.u32 4294901760, %v1834_v0  ;;  %v5499_v41 = vand.u32 4294901760, %v1833_v37  ;;  %v1848_v56 = vld [vmem:[%s6236_s4 + $0xb8] sm:$0xff] }
 0x253   : > { %1778 = vmatprep.subr.mxu1 %v5116_v51  ;;  %6404 = vst [vmem:[#allocation3_spill] sm:$0xff] %v5300_v60  ;;  %v5318_v30 = vand.u32 4294901760, %v5300_v60  ;;  %v5361_v40 = vsub.f32 %v1838_v21, %v5335_v52  ;;  %v5363_v47 = vand.u32 4294901760, %v1837_v62  ;;  %v5377_v46 = vsub.f32 %v1853_v34, %v5349_v8 }
 0x254   : > { %1780 = vmatpush1.msra.mxu1 %v5118_v17  ;;  %v5374_v17 = vand.u32 4294901760, %v5347_v5  ;;  %6415 = vst [vmem:[#allocation14_spill] sm:$0xff] %v5411_v28  ;;  %v2113_v21 = vsub.f32 %v5429_v57, %v5455_v55  ;;  %v5482_v34 = vand.u32 4294901760, %v5458_v59 }
 0x255   : > { %1782 = vmatprep.subr.mxu1 %v5143_v3  ;;  %6405 = vst [vmem:[#allocation4_spill] sm:$0xff] %v5318_v30  ;;  %v2085_v48 = vsub.f32 %v5300_v60, %v5318_v30  ;;  %v5388_v3 = vand.u32 4294901760, %v5361_v40  ;;  %v5403_v19 = vand.u32 4294901760, %v5377_v46  ;;  %v1842_v30 = vld [vmem:[%s6236_s4 + $0x88] sm:$0xff] }
 0x256   : > { %1784 = vmatpush1.msra.mxu1 %v5145_v50  ;;  %6410 = vst [vmem:[#allocation9_spill] sm:$0xff] %v5374_v17  ;;  %v5391_v50 = vsub.f32 %v1837_v62, %v5363_v47  ;;  %v2099_v32 = vsub.f32 %v5347_v5, %v5374_v17  ;;  %6423 = vst [vmem:[#allocation22_spill] sm:$0xff] %v5482_v34  ;;  %v5487_v62 = vand.u32 4294901760, %v1849_v53  ;;  %v5505_v45 = vand.u32 4294901760, %v2113_v21 }
 0x257   : > { %1819 = vmatmul.mubr.f32.vlgmr.msra.gmra.mxu1 %v4961_v42  ;;  %v5302_v42 = vand.u32 4294901760, %v1855_v38  ;;  %v5369_v61 = vand.u32 4294901760, %v2085_v48  ;;  %6412 = vst [vmem:[#allocation11_spill] sm:$0xff] %v5388_v3  ;;  %6414 = vst [vmem:[#allocation13_spill] sm:$0xff] %v5403_v19  ;;  %v1987_v6 = vsub.f32 %v5361_v40, %v5388_v3  ;;  %v2106_v15 = vsub.f32 %v5377_v46, %v5403_v19 }
 0x258   : > { %v5416_v54 = vand.u32 4294901760, %v5391_v50  ;;  %v5424_v33 = vand.u32 4294901760, %v2099_v32  ;;  %v5485_v48 = vsub.f32 %v1850_v58, %v5460_v2  ;;  %6425 = vst [vmem:[#allocation24_spill] sm:$0xff] %v5505_v45  ;;  %v2120_v32 = vsub.f32 %v5458_v59, %v5482_v34  ;;  %v1832_v58 = vld [vmem:[%s6236_s4 + $0x38] sm:$0xff] }
 0x259   : > { %v5321_v39 = vsub.f32 %v1855_v38, %v5302_v42  ;;  %4108 = vmatprep.subr.mxu0 %v5302_v42  ;;  %6409 = vst [vmem:[#allocation8_spill] sm:$0xff] %v5369_v61  ;;  %4141 = vmatprep.subr.mxu1 %v5369_v61  ;;  %v5438_v18 = vand.u32 4294901760, %v1987_v6  ;;  %v5452_v11 = vand.u32 4294901760, %v2106_v15  ;;  %v5470_v38 = vand.u32 4294901760, %v5443_v16  ;;  %v1830_v61 = vld [vmem:[%s6236_s4 + $0x28] sm:$0xff] }
 0x25a   : > { %4109 = vmatpush3.msra.mxu0 %v5311_v26  ;;  %4142 = vmatpush3.msra.mxu1 %v5383_v13  ;;  %6416 = vst [vmem:[#allocation15_spill] sm:$0xff] %v5416_v54  ;;  %6417 = vst [vmem:[#allocation16_spill] sm:$0xff] %v5424_v33  ;;  %v1994_v44 = vsub.f32 %v5391_v50, %v5416_v54  ;;  %v5510_v12 = vand.u32 4294901760, %v5485_v48  ;;  %v5513_v6 = vsub.f32 %v1849_v53, %v5487_v62  ;;  %v1847_v53 = vld [vmem:[%s6236_s4 + $0xb0] sm:$0xff] }
 0x25b   : > { %v5344_v63 = vand.u32 4294901760, %v5321_v39  ;;  %4110 = vmatprep.subr.mxu0 %v5323_v1  ;;  %6418 = vst [vmem:[#allocation17_spill] sm:$0xff] %v5438_v18  ;;  %6419 = vst [vmem:[#allocation18_spill] sm:$0xff] %v5452_v11  ;;  %v2001_v9 = vsub.f32 %v5443_v16, %v5470_v38  ;;  %v5527_v21 = vsub.f32 %v1833_v37, %v5499_v41  ;;  %v5534_v4 = vand.u32 4294901760, %v2120_v32  ;;  %v1831_v37 = vld [vmem:[%s6236_s4 + $0x30] sm:$0xff] }
 0x25c   : > { %4111 = vmatpush3.msra.mxu0 %v5335_v52  ;;  %v5467_v7 = vand.u32 4294901760, %v1994_v44  ;;  %6422 = vst [vmem:[#allocation21_spill] sm:$0xff] %v5470_v38  ;;  %6426 = vst [vmem:[#allocation25_spill] sm:$0xff] %v5510_v12  ;;  %v5567_v13 = vand.u32 4294901760, %v1847_v53 }
 0x25d   : > { %6407 = vst [vmem:[#allocation6_spill] sm:$0xff] %v5344_v63  ;;  %v2092_v51 = vsub.f32 %v5321_v39, %v5344_v63  ;;  %4112 = vmatprep.subr.mxu0 %v5349_v8  ;;  %v5519_v15 = vand.u32 4294901760, %v2001_v9  ;;  %6429 = vst [vmem:[#allocation28_spill] sm:$0xff] %v5534_v4  ;;  %v2127_v9 = vsub.f32 %v5485_v48, %v5510_v12 }
 0x25e   : > { %4113 = vmatpush3.msra.mxu0 %v5363_v47  ;;  %6421 = vst [vmem:[#allocation20_spill] sm:$0xff] %v5467_v7 }
 0x25f   : > { %v5398_v14 = vand.u32 4294901760, %v2092_v51  ;;  %4114 = vmatprep.subr.mxu0 %v5405_v49  ;;  %v5497_v51 = vsub.f32 %v1834_v0, %v5475_v36  ;;  %6427 = vst [vmem:[#allocation26_spill] sm:$0xff] %v5519_v15  ;;  %v2008_v0 = vsub.f32 %v5473_v31, %v5494_v43 }
 0x260   : > { %4115 = vmatpush3.msra.mxu0 %v5418_v27 }
 0x261   : > { %6413 = vst [vmem:[#allocation12_spill] sm:$0xff] %v5398_v14  ;;  %4143 = vmatprep.subr.mxu1 %v5398_v14  ;;  %4116 = vmatprep.subr.mxu0 %v5431_v22  ;;  %v5524_v44 = vand.u32 4294901760, %v5497_v51  ;;  %v5560_v14 = vand.u32 4294901760, %v2127_v9 }
 0x262   : > { %4144 = vmatpush3.msra.mxu1 %v5411_v28  ;;  %4117 = vmatpush3.msra.mxu0 %v5445_v35  ;;  %v1846_v28 = vld [vmem:[%s6236_s4 + $0xa8] sm:$0xff] }
 0x263   : > { %4145 = vmatprep.subr.mxu1 %v5424_v33  ;;  %4118 = vmatprep.subr.mxu0 %v5460_v2  ;;  %6428 = vst [vmem:[#allocation27_spill] sm:$0xff] %v5524_v44  ;;  %v2015_v32 = vsub.f32 %v5497_v51, %v5524_v44  ;;  %v5554_v33 = vand.u32 4294901760, %v1832_v58  ;;  %6433 = vst [vmem:[#allocation32_spill] sm:$0xff] %v5560_v14 }
 0x264   : > { %4146 = vmatpush3.msra.mxu1 %v5438_v18  ;;  %4119 = vmatpush3.msra.mxu0 %v5475_v36  ;;  %v5547_v18 = vand.u32 4294901760, %v2008_v0 }
 0x265   : > { %4147 = vmatprep.subr.mxu1 %v5452_v11  ;;  %4120 = vmatprep.subr.mxu0 %v5487_v62  ;;  %v5541_v11 = vand.u32 4294901760, %v1848_v56  ;;  %v5574_v44 = vand.u32 4294901760, %v2015_v32 }
 0x266   : > { %4148 = vmatpush3.msra.mxu1 %v5467_v7  ;;  %4121 = vmatpush3.msra.mxu0 %v5499_v41  ;;  %v5539_v7 = vand.u32 4294901760, %v5513_v6  ;;  %6431 = vst [vmem:[#allocation30_spill] sm:$0xff] %v5547_v18 }
 0x267   : > { %4149 = vmatprep.subr.mxu1 %v5505_v45  ;;  %v5552_v45 = vand.u32 4294901760, %v5527_v21  ;;  %4122 = vmatprep.subr.mxu0 %v5541_v11  ;;  %6434 = vst [vmem:[#allocation33_spill] sm:$0xff] %v5574_v44 }
 0x268   : > { %6430 = vst [vmem:[#allocation29_spill] sm:$0xff] %v5539_v7  ;;  %4150 = vmatpush3.msra.mxu1 %v5519_v15  ;;  %v2134_v0 = vsub.f32 %v5513_v6, %v5539_v7  ;;  %v5565_v15 = vsub.f32 %v1848_v56, %v5541_v11  ;;  %v5581_v56 = vand.u32 4294901760, %v1831_v37  ;;  %v1845_v7 = vld [vmem:[%s6236_s4 + $0xa0] sm:$0xff]  ;;  %4123 = vmatpush3.msra.mxu0 %v5554_v33 }
 0x269   : > { %6432 = vst [vmem:[#allocation31_spill] sm:$0xff] %v5552_v45  ;;  %4151 = vmatprep.subr.mxu1 %v5534_v4  ;;  %v2022_v9 = vsub.f32 %v5527_v21, %v5552_v45  ;;  %v5579_v4 = vsub.f32 %v1832_v58, %v5554_v33  ;;  %v5596_v58 = vand.u32 4294901760, %v1846_v28  ;;  %v1829_v45 = vld [vmem:[%s6236_s4 + $0x20] sm:$0xff]  ;;  %4124 = vmatprep.subr.mxu0 %v5567_v13 }
 0x26a   : > { %4152 = vmatpush3.msra.mxu1 %v5547_v18  ;;  %v5588_v12 = vand.u32 4294901760, %v2134_v0  ;;  %v5591_v32 = vand.u32 4294901760, %v5565_v15  ;;  %v5594_v18 = vsub.f32 %v1847_v53, %v5567_v13  ;;  %v5611_v53 = vand.u32 4294901760, %v1830_v61  ;;  %4125 = vmatpush3.msra.mxu0 %v5581_v56 }
 0x26b   : > { %6435 = vst [vmem:[#allocation34_spill] sm:$0xff] %v5579_v4  ;;  %4153 = vmatprep.subr.mxu1 %v5560_v14  ;;  %v5603_v43 = vand.u32 4294901760, %v2022_v9  ;;  %v5606_v0 = vand.u32 4294901760, %v5579_v4  ;;  %v5609_v14 = vsub.f32 %v1831_v37, %v5581_v56  ;;  %v5621_v9 = vsub.f32 %v1846_v28, %v5596_v58  ;;  %4126 = vmatprep.subr.mxu0 %v5596_v58  ;;  %v1844_v28 = vld [vmem:[%s6236_s4 + $0x98] sm:$0xff] }
 0x26c   : > { %6436 = vst [vmem:[#allocation35_spill] sm:$0xff] %v5588_v12  ;;  %6437 = vst [vmem:[#allocation36_spill] sm:$0xff] %v5591_v32  ;;  %4154 = vmatpush3.msra.mxu1 %v5574_v44  ;;  %v2141_v34 = vsub.f32 %v5565_v15, %v5591_v32  ;;  %v5618_v38 = vand.u32 4294901760, %v5594_v18  ;;  %v5623_v44 = vand.u32 4294901760, %v1845_v7  ;;  %v5633_v32 = vsub.f32 %v1830_v61, %v5611_v53  ;;  %v1828_v61 = vld [vmem:[%s6236_s4 + $0x18] sm:$0xff] }
 0x26d   : > { %6438 = vst [vmem:[#allocation37_spill] sm:$0xff] %v5594_v18  ;;  %6439 = vst [vmem:[#allocation38_spill] sm:$0xff] %v5603_v43  ;;  %4155 = vmatprep.subr.mxu1 %v5588_v12  ;;  %v2029_v37 = vsub.f32 %v5579_v4, %v5606_v0  ;;  %v5630_v12 = vand.u32 4294901760, %v5609_v14  ;;  %v5635_v55 = vand.u32 4294901760, %v1829_v45  ;;  %4127 = vmatpush3.msra.mxu0 %v5611_v53  ;;  %v5677_v63 = vand.u32 4294901760, %v1844_v28 }
 0x26e   : > { %6440 = vst [vmem:[#allocation39_spill] sm:$0xff] %v5606_v0  ;;  %6441 = vst [vmem:[#allocation40_spill] sm:$0xff] %v5609_v14  ;;  %4156 = vmatpush3.msra.mxu1 %v5603_v43  ;;  %v5641_v54 = vand.u32 4294901760, %v2141_v34  ;;  %v2148_v43 = vsub.f32 %v5594_v18, %v5618_v38  ;;  %v5646_v0 = vand.u32 4294901760, %v5621_v9  ;;  %v5649_v19 = vsub.f32 %v1845_v7, %v5623_v44  ;;  %v1843_v7 = vld [vmem:[%s6236_s4 + $0x90] sm:$0xff] }
 0x26f   : > { %6442 = vst [vmem:[#allocation41_spill] sm:$0xff] %v5618_v38  ;;  %6443 = vst [vmem:[#allocation42_spill] sm:$0xff] %v5621_v9  ;;  %4128 = vmatprep.subr.mxu0 %v5623_v44  ;;  %v5655_v3 = vand.u32 4294901760, %v2029_v37  ;;  %v2036_v34 = vsub.f32 %v5609_v14, %v5630_v12  ;;  %v5660_v17 = vand.u32 4294901760, %v5633_v32  ;;  %v5663_v38 = vsub.f32 %v1829_v45, %v5635_v55  ;;  %v1827_v45 = vld [vmem:[%s6236_s4 + $0x10] sm:$0xff] }
 0x270   : > { %6444 = vst [vmem:[#allocation43_spill] sm:$0xff] %v5630_v12  ;;  %6445 = vst [vmem:[#allocation44_spill] sm:$0xff] %v5633_v32  ;;  %4129 = vmatpush3.msra.mxu0 %v5635_v55  ;;  %4157 = vmatprep.subr.mxu1 %v5641_v54  ;;  %v5670_v29 = vand.u32 4294901760, %v2148_v43  ;;  %v2155_v37 = vsub.f32 %v5621_v9, %v5646_v0  ;;  %v5675_v12 = vand.u32 4294901760, %v5649_v19 }
 0x271   : > { %6446 = vst [vmem:[#allocation45_spill] sm:$0xff] %v5641_v54  ;;  %6447 = vst [vmem:[#allocation46_spill] sm:$0xff] %v5646_v0  ;;  %4158 = vmatpush3.msra.mxu1 %v5655_v3  ;;  %v5683_v23 = vand.u32 4294901760, %v2036_v34  ;;  %v2043_v43 = vsub.f32 %v5633_v32, %v5660_v17  ;;  %v5688_v54 = vand.u32 4294901760, %v5663_v38  ;;  %v5690_v0 = vand.u32 4294901760, %v1828_v61  ;;  %v1826_v32 = vld [vmem:[%s6236_s4 + $0x8] sm:$0xff]  ;;  %4130 = vmatprep.subr.mxu0 %v5677_v63 }
 0x272   : > { %6448 = vst [vmem:[#allocation47_spill] sm:$0xff] %v5649_v19  ;;  %6449 = vst [vmem:[#allocation48_spill] sm:$0xff] %v5655_v3  ;;  %4159 = vmatprep.subr.mxu1 %v5670_v29  ;;  %v5696_v9 = vand.u32 4294901760, %v2155_v37  ;;  %v2162_v34 = vsub.f32 %v5649_v19, %v5675_v12  ;;  %v5701_v3 = vsub.f32 %v1844_v28, %v5677_v63  ;;  %v5717_v28 = vand.u32 4294901760, %v1827_v45 }
 0x273   : > { %6450 = vst [vmem:[#allocation49_spill] sm:$0xff] %v5660_v17  ;;  %6451 = vst [vmem:[#allocation50_spill] sm:$0xff] %v5663_v38  ;;  %v5703_v17 = vand.u32 4294901760, %v1843_v7  ;;  %4160 = vmatpush3.msra.mxu1 %v5683_v23  ;;  %v5710_v14 = vand.u32 4294901760, %v2043_v43  ;;  %v2050_v37 = vsub.f32 %v5663_v38, %v5688_v54  ;;  %4131 = vmatpush3.msra.mxu0 %v5690_v0 }
 0x274   : > { %6452 = vst [vmem:[#allocation51_spill] sm:$0xff] %v5670_v29  ;;  %6453 = vst [vmem:[#allocation52_spill] sm:$0xff] %v5675_v12  ;;  %v5715_v29 = vsub.f32 %v1828_v61, %v5690_v0  ;;  %v1841_v12 = vld [vmem:[%s6236_s4 + $0x80] sm:$0xff]  ;;  %4161 = vmatprep.subr.mxu1 %v5696_v9  ;;  %v5724_v19 = vand.u32 4294901760, %v2162_v34  ;;  %v5727_v43 = vand.u32 4294901760, %v5701_v3  ;;  %v5732_v61 = vand.u32 4294901760, %v1842_v30 }
 0x275   : > { %6454 = vst [vmem:[#allocation53_spill] sm:$0xff] %v5683_v23  ;;  %6455 = vst [vmem:[#allocation54_spill] sm:$0xff] %v5688_v54  ;;  %v5730_v23 = vsub.f32 %v1843_v7, %v5703_v17  ;;  %v1825_v54 = vld [vmem:[%s6236_s4] sm:$0xff]  ;;  %4132 = vmatprep.subr.mxu0 %v5703_v17  ;;  %4162 = vmatpush3.msra.mxu1 %v5710_v14  ;;  %v5739_v38 = vand.u32 4294901760, %v2050_v37  ;;  %v5747_v7 = vand.u32 4294901760, %v1826_v32 }
 0x276   : > { %6456 = vst [vmem:[#allocation55_spill] sm:$0xff] %v5690_v0  ;;  %6457 = vst [vmem:[#allocation56_spill] sm:$0xff] %v5696_v9  ;;  %v5742_v34 = vand.u32 4294901760, %v5715_v29  ;;  %v5745_v9 = vsub.f32 %v1827_v45, %v5717_v28  ;;  %4133 = vmatpush3.msra.mxu0 %v5717_v28  ;;  %4163 = vmatprep.subr.mxu1 %v5724_v19  ;;  %v2169_v18 = vsub.f32 %v5701_v3, %v5727_v43 }
 0x277   : > { %6458 = vst [vmem:[#allocation57_spill] sm:$0xff] %v5701_v3  ;;  %6459 = vst [vmem:[#allocation58_spill] sm:$0xff] %v5703_v17  ;;  %v5754_v17 = vand.u32 4294901760, %v5730_v23  ;;  %v5757_v37 = vsub.f32 %v1842_v30, %v5732_v61  ;;  %4134 = vmatprep.subr.mxu0 %v5732_v61  ;;  %4164 = vmatpush3.msra.mxu1 %v5739_v38  ;;  %v5771_v3 = vand.u32 4294901760, %v1825_v54 }
 0x278   : > { %6460 = vst [vmem:[#allocation59_spill] sm:$0xff] %v5710_v14  ;;  %6461 = vst [vmem:[#allocation60_spill] sm:$0xff] %v5715_v29  ;;  %v5759_v14 = vand.u32 4294901760, %v1841_v12  ;;  %v2057_v45 = vsub.f32 %v5715_v29, %v5742_v34  ;;  %4135 = vmatpush3.msra.mxu0 %v5747_v7  ;;  %v5774_v30 = vand.u32 4294901760, %v2169_v18 }
 0x279   : > { %6462 = vst [vmem:[#allocation61_spill] sm:$0xff] %v5717_v28  ;;  %6463 = vst [vmem:[#allocation62_spill] sm:$0xff] %v5724_v19  ;;  %v5766_v19 = vand.u32 4294901760, %v5745_v9  ;;  %v5793_v18 = vsub.f32 %v1825_v54, %v5771_v3 }
 0x27a   : > { %6464 = vst [vmem:[#allocation63_spill] sm:$0xff] %v5727_v43  ;;  %6465 = vst [vmem:[#allocation64_spill] sm:$0xff] %v5730_v23  ;;  %v5769_v43 = vsub.f32 %v1826_v32, %v5747_v7  ;;  %4136 = vmatprep.subr.mxu0 %v5759_v14  ;;  %v5785_v29 = vand.u32 4294901760, %v2057_v45  ;;  %4165 = vmatprep.subr.mxu1 %v5774_v30 }
 0x27b   : > { %6466 = vst [vmem:[#allocation65_spill] sm:$0xff] %v5732_v61  ;;  %6467 = vst [vmem:[#allocation66_spill] sm:$0xff] %v5739_v38  ;;  %v2176_v61 = vsub.f32 %v5730_v23, %v5754_v17  ;;  %v5779_v38 = vand.u32 4294901760, %v5757_v37  ;;  %v2064_v32 = vsub.f32 %v5745_v9, %v5766_v19  ;;  %4137 = vmatpush3.msra.mxu0 %v5771_v3 }
 0x27c   : > { %6468 = vst [vmem:[#allocation67_spill] sm:$0xff] %v5742_v34  ;;  %6469 = vst [vmem:[#allocation68_spill] sm:$0xff] %v5745_v9  ;;  %v5782_v34 = vsub.f32 %v1841_v12, %v5759_v14  ;;  %4176 = vmatprep.subr.mxu0 %v5300_v60  ;;  %4166 = vmatpush3.msra.mxu1 %v5785_v29  ;;  %v5811_v9 = vand.u32 4294901760, %v5793_v18 }
 0x27d   : > { %6470 = vst [vmem:[#allocation69_spill] sm:$0xff] %v5747_v7  ;;  %6471 = vst [vmem:[#allocation70_spill] sm:$0xff] %v5754_v17  ;;  %v5790_v7 = vand.u32 4294901760, %v5769_v43  ;;  %v5797_v17 = vand.u32 4294901760, %v2176_v61  ;;  %v2183_v12 = vsub.f32 %v5757_v37, %v5779_v38 }
 0x27e   : > { %6472 = vst [vmem:[#allocation71_spill] sm:$0xff] %v5757_v37  ;;  %6473 = vst [vmem:[#allocation72_spill] sm:$0xff] %v5759_v14  ;;  %v5802_v45 = vand.u32 4294901760, %v5782_v34 }
 0x27f   : > { %6474 = vst [vmem:[#allocation73_spill] sm:$0xff] %v5766_v19  ;;  %6475 = vst [vmem:[#allocation74_spill] sm:$0xff] %v5769_v43  ;;  %v5806_v19 = vand.u32 4294901760, %v2064_v32  ;;  %v2071_v54 = vsub.f32 %v5769_v43, %v5790_v7  ;;  %4167 = vmatprep.subr.mxu1 %v5797_v17  ;;  %v5814_v61 = vand.u32 4294901760, %v2183_v12  ;;  %v2078_v32 = vsub.f32 %v5793_v18, %v5811_v9 }
 0x280   : > { %6476 = vst [vmem:[#allocation75_spill] sm:$0xff] %v5771_v3  ;;  %6477 = vst [vmem:[#allocation76_spill] sm:$0xff] %v5774_v30  ;;  %v2190_v30 = vsub.f32 %v5782_v34, %v5802_v45 }
 0x281   : > { %6478 = vst [vmem:[#allocation77_spill] sm:$0xff] %v5779_v38  ;;  %6479 = vst [vmem:[#allocation78_spill] sm:$0xff] %v5782_v34  ;;  %4168 = vmatpush3.msra.mxu1 %v5806_v19  ;;  %v5819_v60 = vand.u32 4294901760, %v2071_v54 }
 0x282   : > { %6480 = vst [vmem:[#allocation79_spill] sm:$0xff] %v5785_v29  ;;  %6481 = vst [vmem:[#allocation80_spill] sm:$0xff] %v5790_v7  ;;  %4169 = vmatprep.subr.mxu1 %v5814_v61  ;;  %v5824_v29 = vand.u32 4294901760, %v2190_v30  ;;  %v5827_v7 = vand.u32 4294901760, %v2078_v32 }
 0x283   : > { %6482 = vst [vmem:[#allocation81_spill] sm:$0xff] %v5793_v18  ;;  %6483 = vst [vmem:[#allocation82_spill] sm:$0xff] %v5797_v17  ;;  %4170 = vmatpush3.msra.mxu1 %v5819_v60 }
 0x284   : > { %6484 = vst [vmem:[#allocation83_spill] sm:$0xff] %v5802_v45  ;;  %6485 = vst [vmem:[#allocation84_spill] sm:$0xff] %v5806_v19  ;;  %4171 = vmatprep.subr.mxu1 %v5824_v29 }
 0x285   : > { %6486 = vst [vmem:[#allocation85_spill] sm:$0xff] %v5811_v9  ;;  %6487 = vst [vmem:[#allocation86_spill] sm:$0xff] %v5814_v61  ;;  %4172 = vmatpush3.msra.mxu1 %v5827_v7 }
 0x286   : > { %6488 = vst [vmem:[#allocation87_spill] sm:$0xff] %v5819_v60  ;;  %6489 = vst [vmem:[#allocation88_spill] sm:$0xff] %v5824_v29  ;;  %4211 = vmatprep.subr.mxu1 %v5289_v10 }
 0x287   : > { %6490 = vst [vmem:[#allocation89_spill] sm:$0xff] %v5827_v7 }
 0x2e7   : > { %v1241_v12 = vpop.f32.mrf.mxu0 }
 0x2e9   : > { %v1243_v54 = vpop.f32.mrf.mxu0 }
 0x2f1   : > { %v1403_v19 = vpop.f32.mrf.mxu1 }
 0x2f2   : > { %v1404_v61 = vadd.f32 %v1403_v19, %v1241_v12  ;;  %v6501_v12 = vld [vmem:[#allocation47_spill] sm:$0xff] }
 0x2f3   : > { %v1405_v45 = vpop.f32.mrf.mxu1 }
 0x2f4   : > { %v1406_v18 = vadd.f32 %v1405_v45, %v1243_v54  ;;  %v6499_v45 = vld [vmem:[#allocation44_spill] sm:$0xff] }
 0x2f5   : > { %v6502_v54 = vld [vmem:[#allocation72_spill] sm:$0xff] }
 0x2fb   : > { %v1512_v17 = vpop.f32.mrf.mxu0 }
 0x2fc   : > { %v1513_v34 = vadd.f32 %v1512_v17, %v1404_v61  ;;  %v6500_v61 = vld [vmem:[#allocation69_spill] sm:$0xff] }
 0x2fd   : > { %v1514_v9 = vpop.f32.mrf.mxu0 }
 0x2fe   : > { %v1515_v32 = vadd.f32 %v1514_v9, %v1406_v18  ;;  %v6498_v18 = vld [vmem:[#allocation65_spill] sm:$0xff] }
 0x304   : > { %v1604_v38 = vpop.f32.mrf.mxu1 }
 0x305   : > { %v1605_v43 = vadd.f32 %v1604_v38, %v1513_v34  ;;  %v6492_v38 = vld [vmem:[#allocation55_spill] sm:$0xff]  ;;  %v6495_v34 = vld [vmem:[#allocation40_spill] sm:$0xff] }
 0x306   : > { %v1606_v60 = vpop.f32.mrf.mxu1 }
 0x307   : > { %v1607_v29 = vadd.f32 %v1606_v60, %v1515_v32  ;;  %v6504_v32 = vld [vmem:[#allocation75_spill] sm:$0xff] }
 0x30f   : > { %v1730_v30 = vpop.f32.mrf.mxu0 }
 0x310   : > { %v1731_v23 = vadd.f32 %v1730_v30, %v1605_v43  ;;  %v6494_v43 = vld [vmem:[#allocation58_spill] sm:$0xff] }
 0x311   : > { %v1732_v37 = vpop.f32.mrf.mxu0  ;;  %v6503_v30 = vld [vmem:[#allocation50_spill] sm:$0xff] }
 0x312   : > { %v1733_v3 = vadd.f32 %v1732_v37, %v1607_v29  ;;  %v6497_v37 = vld [vmem:[#allocation42_spill] sm:$0xff] }
 0x317   : > { %v1820_v7 = vpop.f32.mrf.mxu1 }
 0x318   : > { %v1821_v10 = vadd.f32 %v1820_v7, %v1731_v23  ;;  %v6496_v7 = vld [vmem:[#allocation61_spill] sm:$0xff] }
 0x319   : > { %v1822_v14 = vpop.f32.mrf.mxu1 }
 0x31a   : > { %v5832_v28 = vand.u32 4294901760, %v1821_v10  ;;  %v1823_v0 = vadd.f32 %v1822_v14, %v1733_v3  ;;  %v6491_v14 = vld [vmem:[#allocation34_spill] sm:$0xff] }
 0x31c   : > { %v5835_v4 = vsub.f32 %v1821_v10, %v5832_v28  ;;  %v5837_v19 = vand.u32 4294901760, %v1823_v0 }
 0x31e   : > { %v1961_v17 = vand.u32 4294901760, %v5835_v4  ;;  %v1954_v9 = vsub.f32 %v1823_v0, %v5837_v19  ;;  %2194 = vmatprep.mubr.f32.mxu1 %v5837_v19  ;;  %v6493_v0 = vld [vmem:[#allocation37_spill] sm:$0xff] }
 0x31f   : > { %2196 = vmatmul.mubr.f32.vlgmr.msra.gmra.mxu1 %v5832_v28 }
 0x320   : > { %4212 = vmatpush3.msra.mxu1 %v5294_v20  ;;  %v1955_v60 = vand.u32 4294901760, %v1954_v9  ;;  %v1962_v23 = vsub.f32 %v5835_v4, %v1961_v17 }
 0x321   : > { %4213 = vmatprep.subr.mxu1 %v5302_v42 }
 0x322   : > { %4214 = vmatpush3.msra.mxu1 %v5311_v26  ;;  %2438 = vmatprep.mubr.f32.mxu1 %v1955_v60  ;;  %v1956_v10 = vsub.f32 %v1954_v9, %v1955_v60  ;;  %v1963_v3 = vand.u32 4294901760, %v1962_v23  ;;  %v6506_v60 = vld [vmem:[#allocation2_spill] sm:$0xff]  ;;  %v6507_v23 = vld [vmem:[#allocation60_spill] sm:$0xff] }
 0x323   : > { %4215 = vmatprep.subr.mxu1 %v5323_v1 }
 0x324   : > { %4216 = vmatpush3.msra.mxu1 %v5335_v52  ;;  %v1957_v29 = vand.u32 4294901760, %v1956_v10  ;;  %v6508_v10 = vld [vmem:[#allocation64_spill] sm:$0xff] }
 0x325   : > { %4217 = vmatprep.subr.mxu1 %v5349_v8 }
 0x326   : > { %4218 = vmatpush3.msra.mxu1 %v5363_v47  ;;  %1958 = vmatprep.mubr.f32.mxu0 %v1957_v29  ;;  %v6509_v29 = vld [vmem:[#allocation68_spill] sm:$0xff] }
 0x327   : > { %4219 = vmatprep.subr.mxu1 %v5405_v49  ;;  %1964 = vmatmul.mubr.f32.vlgmr.msra.gmra.mxu0 %v1963_v3  ;;  %v6510_v3 = vld [vmem:[#allocation71_spill] sm:$0xff] }
 0x328   : > { %4177 = vmatpush3.msra.mxu0 %v5309_v25  ;;  %4220 = vmatpush3.msra.mxu1 %v5418_v27 }
 0x329   : > { %4178 = vmatprep.subr.mxu0 %v5321_v39  ;;  %2331 = vmatprep.mubr.f32.mxu0 %v1954_v9  ;;  %v6505_v9 = vld [vmem:[#allocation57_spill] sm:$0xff] }
 0x32a   : > { %4221 = vmatprep.subr.mxu1 %v5431_v22  ;;  %4179 = vmatpush3.msra.mxu0 %v5333_v24 }
 0x32b   : > { %4222 = vmatpush3.msra.mxu1 %v5445_v35  ;;  %4180 = vmatprep.subr.mxu0 %v5347_v5 }
 0x32c   : > { %4223 = vmatprep.subr.mxu1 %v5460_v2  ;;  %4181 = vmatpush3.msra.mxu0 %v5361_v40 }
 0x32d   : > { %4224 = vmatpush3.msra.mxu1 %v5475_v36  ;;  %4182 = vmatprep.subr.mxu0 %v5377_v46 }
 0x32e   : > { %4225 = vmatprep.subr.mxu1 %v5487_v62  ;;  %4183 = vmatpush3.msra.mxu0 %v5391_v50 }
 0x32f   : > { %4226 = vmatpush3.msra.mxu1 %v5499_v41  ;;  %4184 = vmatprep.subr.mxu0 %v5429_v57 }
 0x330   : > { %4227 = vmatprep.subr.mxu1 %v5541_v11  ;;  %4185 = vmatpush3.msra.mxu0 %v5443_v16 }
 0x331   : > { %4228 = vmatpush3.msra.mxu1 %v5554_v33  ;;  %4186 = vmatprep.subr.mxu0 %v5458_v59 }
 0x332   : > { %4229 = vmatprep.subr.mxu1 %v5567_v13  ;;  %4187 = vmatpush3.msra.mxu0 %v5473_v31 }
 0x333   : > { %4230 = vmatpush3.msra.mxu1 %v5581_v56  ;;  %4188 = vmatprep.subr.mxu0 %v5485_v48 }
 0x334   : > { %4231 = vmatprep.subr.mxu1 %v5596_v58  ;;  %4189 = vmatpush3.msra.mxu0 %v5497_v51 }
 0x335   : > { %4232 = vmatpush3.msra.mxu1 %v5611_v53  ;;  %4190 = vmatprep.subr.mxu0 %v5513_v6 }
 0x336   : > { %4233 = vmatprep.subr.mxu1 %v5623_v44  ;;  %4191 = vmatpush3.msra.mxu0 %v5527_v21 }
 0x337   : > { %4234 = vmatpush3.msra.mxu1 %v5635_v55  ;;  %4192 = vmatprep.subr.mxu0 %v5565_v15 }
 0x338   : > { %4235 = vmatprep.subr.mxu1 %v5677_v63  ;;  %4193 = vmatpush3.msra.mxu0 %v6491_v14 }
 0x339   : > { %4236 = vmatpush3.msra.mxu1 %v6492_v38  ;;  %4194 = vmatprep.subr.mxu0 %v6493_v0 }
 0x33a   : > { %4237 = vmatprep.subr.mxu1 %v6494_v43  ;;  %4195 = vmatpush3.msra.mxu0 %v6495_v34 }
 0x33b   : > { %4238 = vmatpush3.msra.mxu1 %v6496_v7  ;;  %4196 = vmatprep.subr.mxu0 %v6497_v37 }
 0x33c   : > { %4239 = vmatprep.subr.mxu1 %v6498_v18  ;;  %4197 = vmatpush3.msra.mxu0 %v6499_v45 }
 0x33d   : > { %4240 = vmatpush3.msra.mxu1 %v6500_v61  ;;  %4198 = vmatprep.subr.mxu0 %v6501_v12  ;;  %v6548_v12 = vld [vmem:[#allocation83_spill] sm:$0xff] }
 0x33e   : > { %4241 = vmatprep.subr.mxu1 %v6502_v54  ;;  %4199 = vmatpush3.msra.mxu0 %v6503_v30  ;;  %v6546_v30 = vld [vmem:[#allocation80_spill] sm:$0xff] }
 0x33f   : > { %4242 = vmatpush3.msra.mxu1 %v6504_v32  ;;  %4200 = vmatprep.subr.mxu0 %v6505_v9  ;;  %v6513_v9 = vld [vmem:[#allocation81_spill] sm:$0xff] }
 0x340   : > { %2442 = vmatmul.mubr.f32.vlgmr.msra.gmra.mxu1 %v1961_v17  ;;  %4281 = vmatprep.subr.mxu1 %v6506_v60  ;;  %v6511_v17 = vld [vmem:[#allocation74_spill] sm:$0xff] }
 0x341   : > { %4201 = vmatpush3.msra.mxu0 %v6507_v23  ;;  %4282 = vmatpush3.msra.mxu1 %v5294_v20  ;;  %v6512_v23 = vld [vmem:[#allocation78_spill] sm:$0xff] }
 0x342   : > { %2712 = vmatprep.mubr.f32.mxu1 %v5837_v19  ;;  %4202 = vmatprep.subr.mxu0 %v6508_v10  ;;  %v6543_v10 = vld [vmem:[#allocation10_spill] sm:$0xff] }
 0x343   : > { %4283 = vmatprep.subr.mxu1 %v5302_v42  ;;  %4203 = vmatpush3.msra.mxu0 %v6509_v29  ;;  %v6514_v29 = vld [vmem:[#allocation4_spill] sm:$0xff] }
 0x344   : > { %4284 = vmatpush3.msra.mxu1 %v5311_v26  ;;  %4204 = vmatprep.subr.mxu0 %v6510_v3  ;;  %v6515_v3 = vld [vmem:[#allocation5_spill] sm:$0xff] }
 0x345   : > { %4285 = vmatprep.subr.mxu1 %v5323_v1  ;;  %4205 = vmatpush3.msra.mxu0 %v6511_v17  ;;  %v6516_v17 = vld [vmem:[#allocation6_spill] sm:$0xff] }
 0x346   : > { %4286 = vmatpush3.msra.mxu1 %v5335_v52  ;;  %4206 = vmatprep.subr.mxu0 %v6512_v23  ;;  %v6517_v23 = vld [vmem:[#allocation7_spill] sm:$0xff] }
 0x347   : > { %4287 = vmatprep.subr.mxu1 %v5349_v8  ;;  %4207 = vmatpush3.msra.mxu0 %v6513_v9  ;;  %v6518_v9 = vld [vmem:[#allocation9_spill] sm:$0xff] }
 0x348   : > { %4288 = vmatpush3.msra.mxu1 %v5363_v47  ;;  %2334 = vmatmul.mubr.f32.vlgmr.msra.gmra.mxu0 %v5835_v4  ;;  %v6519_v4 = vld [vmem:[#allocation11_spill] sm:$0xff] }
 0x349   : > { %4246 = vmatprep.subr.mxu0 %v6514_v29  ;;  %4289 = vmatprep.subr.mxu1 %v5405_v49  ;;  %v6541_v29 = vld [vmem:[#allocation8_spill] sm:$0xff] }
 0x34a   : > { %4247 = vmatpush3.msra.mxu0 %v6515_v3  ;;  %2608 = vmatprep.mubr.f32.mxu0 %v5837_v19  ;;  %v6520_v3 = vld [vmem:[#allocation13_spill] sm:$0xff]  ;;  %v6521_v19 = vld [vmem:[#allocation15_spill] sm:$0xff] }
 0x34b   : > { %4290 = vmatpush3.msra.mxu1 %v5418_v27  ;;  %4248 = vmatprep.subr.mxu0 %v6516_v17  ;;  %v6522_v17 = vld [vmem:[#allocation19_spill] sm:$0xff] }
 0x34c   : > { %4291 = vmatprep.subr.mxu1 %v5431_v22  ;;  %4249 = vmatpush3.msra.mxu0 %v6517_v23  ;;  %v6523_v23 = vld [vmem:[#allocation21_spill] sm:$0xff] }
 0x34d   : > { %4292 = vmatpush3.msra.mxu1 %v5445_v35  ;;  %4250 = vmatprep.subr.mxu0 %v6518_v9  ;;  %v6524_v9 = vld [vmem:[#allocation22_spill] sm:$0xff] }
 0x34e   : > { %4293 = vmatprep.subr.mxu1 %v5460_v2  ;;  %4251 = vmatpush3.msra.mxu0 %v6519_v4  ;;  %v6525_v4 = vld [vmem:[#allocation23_spill] sm:$0xff] }
 0x34f   : > { %4294 = vmatpush3.msra.mxu1 %v5475_v36  ;;  %4252 = vmatprep.subr.mxu0 %v6520_v3  ;;  %v6526_v3 = vld [vmem:[#allocation25_spill] sm:$0xff] }
 0x350   : > { %4295 = vmatprep.subr.mxu1 %v5487_v62  ;;  %4253 = vmatpush3.msra.mxu0 %v6521_v19  ;;  %v6527_v19 = vld [vmem:[#allocation27_spill] sm:$0xff] }
 0x351   : > { %4296 = vmatpush3.msra.mxu1 %v5499_v41  ;;  %4254 = vmatprep.subr.mxu0 %v6522_v17  ;;  %v6528_v17 = vld [vmem:[#allocation29_spill] sm:$0xff] }
 0x352   : > { %4297 = vmatprep.subr.mxu1 %v5541_v11  ;;  %4255 = vmatpush3.msra.mxu0 %v6523_v23  ;;  %v6529_v23 = vld [vmem:[#allocation31_spill] sm:$0xff] }
 0x353   : > { %4298 = vmatpush3.msra.mxu1 %v5554_v33  ;;  %4256 = vmatprep.subr.mxu0 %v6524_v9  ;;  %v6530_v9 = vld [vmem:[#allocation36_spill] sm:$0xff] }
 0x354   : > { %4299 = vmatprep.subr.mxu1 %v5567_v13  ;;  %4257 = vmatpush3.msra.mxu0 %v6525_v4  ;;  %v6531_v4 = vld [vmem:[#allocation39_spill] sm:$0xff] }
 0x355   : > { %4300 = vmatpush3.msra.mxu1 %v5581_v56  ;;  %4258 = vmatprep.subr.mxu0 %v6526_v3  ;;  %v6532_v3 = vld [vmem:[#allocation41_spill] sm:$0xff] }
 0x356   : > { %4301 = vmatprep.subr.mxu1 %v5596_v58  ;;  %4259 = vmatpush3.msra.mxu0 %v6527_v19  ;;  %v6533_v19 = vld [vmem:[#allocation43_spill] sm:$0xff] }
 0x357   : > { %4302 = vmatpush3.msra.mxu1 %v5611_v53  ;;  %4260 = vmatprep.subr.mxu0 %v6528_v17  ;;  %v6534_v17 = vld [vmem:[#allocation46_spill] sm:$0xff] }
 0x358   : > { %4303 = vmatprep.subr.mxu1 %v5623_v44  ;;  %4261 = vmatpush3.msra.mxu0 %v6529_v23  ;;  %v6535_v23 = vld [vmem:[#allocation49_spill] sm:$0xff] }
 0x359   : > { %4304 = vmatpush3.msra.mxu1 %v5635_v55  ;;  %4262 = vmatprep.subr.mxu0 %v6530_v9  ;;  %v6536_v9 = vld [vmem:[#allocation52_spill] sm:$0xff] }
 0x35a   : > { %4305 = vmatprep.subr.mxu1 %v5677_v63  ;;  %4263 = vmatpush3.msra.mxu0 %v6531_v4  ;;  %v6537_v4 = vld [vmem:[#allocation54_spill] sm:$0xff] }
 0x35b   : > { %4306 = vmatpush3.msra.mxu1 %v6492_v38  ;;  %4264 = vmatprep.subr.mxu0 %v6532_v3  ;;  %v6538_v3 = vld [vmem:[#allocation63_spill] sm:$0xff] }
 0x35c   : > { %4307 = vmatprep.subr.mxu1 %v6494_v43  ;;  %4265 = vmatpush3.msra.mxu0 %v6533_v19  ;;  %v6539_v19 = vld [vmem:[#allocation67_spill] sm:$0xff] }
 0x35d   : > { %4308 = vmatpush3.msra.mxu1 %v6496_v7  ;;  %4266 = vmatprep.subr.mxu0 %v6534_v17  ;;  %v6540_v17 = vld [vmem:[#allocation70_spill] sm:$0xff] }
 0x35e   : > { %4309 = vmatprep.subr.mxu1 %v6498_v18  ;;  %4267 = vmatpush3.msra.mxu0 %v6535_v23  ;;  %v6542_v23 = vld [vmem:[#allocation73_spill] sm:$0xff] }
 0x35f   : > { %4310 = vmatpush3.msra.mxu1 %v6500_v61  ;;  %4268 = vmatprep.subr.mxu0 %v6536_v9  ;;  %v6544_v9 = vld [vmem:[#allocation77_spill] sm:$0xff] }
 0x360   : > { %4311 = vmatprep.subr.mxu1 %v6502_v54  ;;  %4269 = vmatpush3.msra.mxu0 %v6537_v4  ;;  %v6545_v4 = vld [vmem:[#allocation12_spill] sm:$0xff] }
 0x361   : > { %4312 = vmatpush3.msra.mxu1 %v6504_v32  ;;  %4270 = vmatprep.subr.mxu0 %v6538_v3  ;;  %v6547_v3 = vld [vmem:[#allocation14_spill] sm:$0xff] }
 0x362   : > { %2714 = vmatmul.mubr.f32.vlgmr.msra.gmra.mxu1 %v5832_v28  ;;  %4271 = vmatpush3.msra.mxu0 %v6539_v19  ;;  %v6549_v19 = vld [vmem:[#allocation16_spill] sm:$0xff] }
 0x363   : > { %4272 = vmatprep.subr.mxu0 %v6540_v17  ;;  %4351 = vmatprep.subr.mxu1 %v6541_v29  ;;  %v6550_v17 = vld [vmem:[#allocation85_spill] sm:$0xff] }
 0x364   : > { %4273 = vmatpush3.msra.mxu0 %v6542_v23  ;;  %4352 = vmatpush3.msra.mxu1 %v6543_v10  ;;  %v6551_v29 = vld [vmem:[#allocation17_spill] sm:$0xff]  ;;  %v6552_v10 = vld [vmem:[#allocation18_spill] sm:$0xff] }
 0x365   : > { %4274 = vmatprep.subr.mxu0 %v6544_v9  ;;  %4353 = vmatprep.subr.mxu1 %v6545_v4  ;;  %v6553_v4 = vld [vmem:[#allocation20_spill] sm:$0xff] }
 0x366   : > { %4275 = vmatpush3.msra.mxu0 %v6546_v30  ;;  %4354 = vmatpush3.msra.mxu1 %v6547_v3  ;;  %v4587_v3 = vld [vmem:[%s4657_s26] sm:$0xff]  ;;  %v6562_v30 = vld [vmem:[#allocation45_spill] sm:$0xff]  ;;  %v6566_v9 = vld [vmem:[#allocation56_spill] sm:$0xff] }
 0x367   : > { %4276 = vmatprep.subr.mxu0 %v6548_v12  ;;  %4355 = vmatprep.subr.mxu1 %v6549_v19  ;;  %v2720_v12 = vcombine.high %v4587_v3, %v4587_v3  ;;  %v6554_v19 = vld [vmem:[#allocation24_spill] sm:$0xff] }
 0x368   : > { %4277 = vmatpush3.msra.mxu0 %v6550_v17  ;;  %4356 = vmatpush3.msra.mxu1 %v6551_v29  ;;  %v6555_v29 = vld [vmem:[#allocation26_spill] sm:$0xff] }
 0x369   : > { %2610 = vmatmul.mubr.f32.vlgmr.msra.gmra.mxu0 %v5832_v28  ;;  %4316 = vmatprep.subr.mxu0 %v6506_v60  ;;  %v6556_v28 = vld [vmem:[#allocation28_spill] sm:$0xff]  ;;  %v5999_v17 = vand.u32 4294901760, %v2720_v12 }
 0x36a   : > { %4317 = vmatpush3.msra.mxu0 %v5294_v20  ;;  %4357 = vmatprep.subr.mxu1 %v6552_v10  ;;  %v6557_v10 = vld [vmem:[#allocation30_spill] sm:$0xff] }
 0x36b   : > { %4318 = vmatprep.subr.mxu0 %v5302_v42  ;;  %4358 = vmatpush3.msra.mxu1 %v6553_v4  ;;  %v6558_v4 = vld [vmem:[#allocation32_spill] sm:$0xff] }
 0x36c   : > { %4319 = vmatpush3.msra.mxu0 %v5311_v26  ;;  %4359 = vmatprep.subr.mxu1 %v6554_v19  ;;  %v6559_v19 = vld [vmem:[#allocation33_spill] sm:$0xff] }
 0x36d   : > { %4320 = vmatprep.subr.mxu0 %v5323_v1  ;;  %4360 = vmatpush3.msra.mxu1 %v6555_v29  ;;  %v6560_v29 = vld [vmem:[#allocation35_spill] sm:$0xff] }
 0x36e   : > { %4321 = vmatpush3.msra.mxu0 %v5335_v52  ;;  %4361 = vmatprep.subr.mxu1 %v6556_v28  ;;  %v6561_v28 = vld [vmem:[#allocation38_spill] sm:$0xff] }
 0x36f   : > { %4322 = vmatprep.subr.mxu0 %v5349_v8  ;;  %4362 = vmatpush3.msra.mxu1 %v6557_v10  ;;  %v6010_v10 = vsub.f32 %v2720_v12, %v5999_v17 }
 0x370   : > { %4323 = vmatpush3.msra.mxu0 %v5363_v47  ;;  %4363 = vmatprep.subr.mxu1 %v6558_v4  ;;  %v6563_v4 = vld [vmem:[#allocation48_spill] sm:$0xff] }
 0x371   : > { %4324 = vmatprep.subr.mxu0 %v5405_v49  ;;  %4364 = vmatpush3.msra.mxu1 %v6559_v19  ;;  %v6016_v19 = vand.u32 4294901760, %v4587_v3  ;;  %v6393_v12 = vand.u32 4294901760, %v6010_v10 }
 0x372   : > { %4325 = vmatpush3.msra.mxu0 %v5418_v27  ;;  %4365 = vmatprep.subr.mxu1 %v6560_v29  ;;  %v6564_v29 = vld [vmem:[#allocation51_spill] sm:$0xff] }
 0x373   : > { %4326 = vmatprep.subr.mxu0 %v5431_v22  ;;  %4366 = vmatpush3.msra.mxu1 %v6561_v28  ;;  %v6565_v28 = vld [vmem:[#allocation53_spill] sm:$0xff]  ;;  %v2821_v23 = vsub.f32 %v6010_v10, %v6393_v12  ;;  %v6574_v12 = vld [vmem:[#allocation86_spill] sm:$0xff] }
 0x374   : > { %4327 = vmatpush3.msra.mxu0 %v5445_v35  ;;  %4367 = vmatprep.subr.mxu1 %v6562_v30  ;;  %v6567_v30 = vld [vmem:[#allocation59_spill] sm:$0xff] }
 0x375   : > { %4328 = vmatprep.subr.mxu0 %v5460_v2  ;;  %4368 = vmatpush3.msra.mxu1 %v6563_v4  ;;  %v6028_v4 = vsub.f32 %v4587_v3, %v6016_v19  ;;  %v6571_v3 = vld [vmem:[#allocation79_spill] sm:$0xff]  ;;  %v2822_v45 = vand.u32 4294901760, %v2821_v23  ;;  %v6577_v23 = vld [vmem:[#allocation89_spill] sm:$0xff] }
 0x376   : > { %4329 = vmatpush3.msra.mxu0 %v5475_v36  ;;  %4369 = vmatprep.subr.mxu1 %v6564_v29  ;;  %v6568_v29 = vld [vmem:[#allocation62_spill] sm:$0xff] }
 0x377   : > { %4330 = vmatprep.subr.mxu0 %v5487_v62  ;;  %4370 = vmatpush3.msra.mxu1 %v6565_v28  ;;  %v6569_v28 = vld [vmem:[#allocation66_spill] sm:$0xff] }
 0x378   : > { %4331 = vmatpush3.msra.mxu0 %v5499_v41  ;;  %4371 = vmatprep.subr.mxu1 %v6566_v9  ;;  %v6570_v9 = vld [vmem:[#allocation76_spill] sm:$0xff] }
 0x379   : > { %4332 = vmatprep.subr.mxu0 %v5541_v11  ;;  %4372 = vmatpush3.msra.mxu1 %v6567_v30  ;;  %v2826_v30 = vand.u32 4294901760, %v6028_v4 }
 0x37a   : > { %4333 = vmatpush3.msra.mxu0 %v5554_v33  ;;  %4373 = vmatprep.subr.mxu1 %v6568_v29  ;;  %v6572_v29 = vld [vmem:[#allocation82_spill] sm:$0xff] }
 0x37b   : > { %4334 = vmatprep.subr.mxu0 %v5567_v13  ;;  %4374 = vmatpush3.msra.mxu1 %v6569_v28  ;;  %v6573_v28 = vld [vmem:[#allocation84_spill] sm:$0xff] }
 0x37c   : > { %4335 = vmatpush3.msra.mxu0 %v5581_v56  ;;  %4375 = vmatprep.subr.mxu1 %v6570_v9  ;;  %v6575_v9 = vld [vmem:[#allocation87_spill] sm:$0xff] }
 0x37d   : > { %4336 = vmatprep.subr.mxu0 %v5596_v58  ;;  %4376 = vmatpush3.msra.mxu1 %v6571_v3  ;;  %v2827_v3 = vsub.f32 %v6028_v4, %v2826_v30 }
 0x37e   : > { %4337 = vmatpush3.msra.mxu0 %v5611_v53  ;;  %4377 = vmatprep.subr.mxu1 %v6572_v29  ;;  %v6576_v29 = vld [vmem:[#allocation88_spill] sm:$0xff] }
 0x37f   : > { %4338 = vmatprep.subr.mxu0 %v5623_v44  ;;  %4378 = vmatpush3.msra.mxu1 %v6573_v28 }
 0x380   : > { %4339 = vmatpush3.msra.mxu0 %v5635_v55  ;;  %4379 = vmatprep.subr.mxu1 %v6574_v12  ;;  %v2828_v12 = vand.u32 4294901760, %v2827_v3 }
 0x381   : > { %4340 = vmatprep.subr.mxu0 %v5677_v63  ;;  %4380 = vmatpush3.msra.mxu1 %v6575_v9 }
 0x382   : > { %4341 = vmatpush3.msra.mxu0 %v6492_v38  ;;  %4381 = vmatprep.subr.mxu1 %v6576_v29 }
 0x383   : > { %4342 = vmatprep.subr.mxu0 %v6494_v43  ;;  %2823 = vmatprep.mubr.f32.mxu0 %v2822_v45  ;;  %v6578_v45 = vld [vmem:[#allocation3_spill] sm:$0xff] }
 0x384   : > { %4343 = vmatpush3.msra.mxu0 %v6496_v7  ;;  %4382 = vmatpush3.msra.mxu1 %v6577_v23 }
 0x385   : > { %4344 = vmatprep.subr.mxu0 %v6498_v18  ;;  %3059 = vmatprep.mubr.f32.mxu1 %v5999_v17 }
 0x386   : > { %4345 = vmatpush3.msra.mxu0 %v6500_v61  ;;  %3061 = vmatmul.mubr.f32.vlgmr.msra.gmra.mxu1 %v6016_v19 }
 0x387   : > { %4346 = vmatprep.subr.mxu0 %v6502_v54  ;;  %4421 = vmatprep.subr.mxu1 %v6506_v60 }
 0x388   : > { %4347 = vmatpush3.msra.mxu0 %v6504_v32  ;;  %4422 = vmatpush3.msra.mxu1 %v5294_v20 }
 0x389   : > { %2829 = vmatmul.mubr.f32.vlgmr.msra.gmra.mxu0 %v2828_v12  ;;  %4386 = vmatprep.subr.mxu0 %v6578_v45 }
 0x38a   : > { %4387 = vmatpush3.msra.mxu0 %v5309_v25  ;;  %4423 = vmatprep.subr.mxu1 %v5302_v42  ;;  %v6579_v25 = vld [vmem:[#allocation44_spill] sm:$0xff] }
 0x38b   : > { %4388 = vmatprep.subr.mxu0 %v5321_v39  ;;  %4424 = vmatpush3.msra.mxu1 %v5311_v26  ;;  %v6580_v39 = vld [vmem:[#allocation47_spill] sm:$0xff] }
 0x38c   : > { %4389 = vmatpush3.msra.mxu0 %v5333_v24  ;;  %4425 = vmatprep.subr.mxu1 %v5323_v1  ;;  %v6581_v24 = vld [vmem:[#allocation50_spill] sm:$0xff] }
 0x38d   : > { %4390 = vmatprep.subr.mxu0 %v5347_v5  ;;  %4426 = vmatpush3.msra.mxu1 %v5335_v52  ;;  %v6582_v5 = vld [vmem:[#allocation57_spill] sm:$0xff] }
 0x38e   : > { %4391 = vmatpush3.msra.mxu0 %v5361_v40  ;;  %4427 = vmatprep.subr.mxu1 %v5349_v8  ;;  %v6583_v40 = vld [vmem:[#allocation60_spill] sm:$0xff] }
 0x38f   : > { %4392 = vmatprep.subr.mxu0 %v5377_v46  ;;  %4428 = vmatpush3.msra.mxu1 %v5363_v47  ;;  %v6584_v46 = vld [vmem:[#allocation64_spill] sm:$0xff] }
 0x390   : > { %4393 = vmatpush3.msra.mxu0 %v5391_v50  ;;  %4429 = vmatprep.subr.mxu1 %v5405_v49  ;;  %v6585_v50 = vld [vmem:[#allocation68_spill] sm:$0xff] }
 0x391   : > { %4394 = vmatprep.subr.mxu0 %v5429_v57  ;;  %4430 = vmatpush3.msra.mxu1 %v5418_v27  ;;  %v6586_v57 = vld [vmem:[#allocation71_spill] sm:$0xff] }
 0x392   : > { %4395 = vmatpush3.msra.mxu0 %v5443_v16  ;;  %4431 = vmatprep.subr.mxu1 %v5431_v22  ;;  %v6587_v16 = vld [vmem:[#allocation74_spill] sm:$0xff] }
 0x393   : > { %4396 = vmatprep.subr.mxu0 %v5458_v59  ;;  %4432 = vmatpush3.msra.mxu1 %v5445_v35  ;;  %v6588_v59 = vld [vmem:[#allocation78_spill] sm:$0xff] }
 0x394   : > { %4397 = vmatpush3.msra.mxu0 %v5473_v31  ;;  %4433 = vmatprep.subr.mxu1 %v5460_v2  ;;  %v6589_v31 = vld [vmem:[#allocation81_spill] sm:$0xff] }
 0x395   : > { %4398 = vmatprep.subr.mxu0 %v5485_v48  ;;  %4434 = vmatpush3.msra.mxu1 %v5475_v36  ;;  %v6590_v48 = vand.u32 4294901760, %v6010_v10 }
 0x396   : > { %4399 = vmatpush3.msra.mxu0 %v5497_v51  ;;  %4435 = vmatprep.subr.mxu1 %v5487_v62  ;;  %v6591_v51 = vld [vmem:[#allocation4_spill] sm:$0xff] }
 0x397   : > { %4400 = vmatprep.subr.mxu0 %v5513_v6  ;;  %4436 = vmatpush3.msra.mxu1 %v5499_v41  ;;  %v6592_v6 = vld [vmem:[#allocation5_spill] sm:$0xff] }
 0x398   : > { %4401 = vmatpush3.msra.mxu0 %v5527_v21  ;;  %4437 = vmatprep.subr.mxu1 %v5541_v11  ;;  %v6594_v21 = vld [vmem:[#allocation7_spill] sm:$0xff] }
 0x399   : > { %4402 = vmatprep.subr.mxu0 %v5565_v15  ;;  %4438 = vmatpush3.msra.mxu1 %v5554_v33  ;;  %v6593_v15 = vld [vmem:[#allocation6_spill] sm:$0xff] }
 0x39a   : > { %4403 = vmatpush3.msra.mxu0 %v6491_v14  ;;  %4439 = vmatprep.subr.mxu1 %v5567_v13  ;;  %v6595_v14 = vld [vmem:[#allocation9_spill] sm:$0xff] }
 0x39b   : > { %4404 = vmatprep.subr.mxu0 %v6493_v0  ;;  %4440 = vmatpush3.msra.mxu1 %v5581_v56  ;;  %v6596_v0 = vld [vmem:[#allocation11_spill] sm:$0xff] }
 0x39c   : > { %4405 = vmatpush3.msra.mxu0 %v6495_v34  ;;  %4441 = vmatprep.subr.mxu1 %v5596_v58  ;;  %v6597_v34 = vld [vmem:[#allocation13_spill] sm:$0xff] }
 0x39d   : > { %4406 = vmatprep.subr.mxu0 %v6497_v37  ;;  %4442 = vmatpush3.msra.mxu1 %v5611_v53 }
 0x39e   : > { %4407 = vmatpush3.msra.mxu0 %v6579_v25  ;;  %4443 = vmatprep.subr.mxu1 %v5623_v44 }
 0x39f   : > { %4408 = vmatprep.subr.mxu0 %v6580_v39  ;;  %4444 = vmatpush3.msra.mxu1 %v5635_v55 }
 0x3a0   : > { %4409 = vmatpush3.msra.mxu0 %v6581_v24  ;;  %4445 = vmatprep.subr.mxu1 %v5677_v63 }
 0x3a1   : > { %4410 = vmatprep.subr.mxu0 %v6582_v5  ;;  %4446 = vmatpush3.msra.mxu1 %v6492_v38 }
 0x3a2   : > { %4411 = vmatpush3.msra.mxu0 %v6583_v40  ;;  %4447 = vmatprep.subr.mxu1 %v6494_v43 }
 0x3a3   : > { %4412 = vmatprep.subr.mxu0 %v6584_v46  ;;  %4448 = vmatpush3.msra.mxu1 %v6496_v7 }
 0x3a4   : > { %4413 = vmatpush3.msra.mxu0 %v6585_v50  ;;  %4449 = vmatprep.subr.mxu1 %v6498_v18 }
 0x3a5   : > { %4414 = vmatprep.subr.mxu0 %v6586_v57  ;;  %4450 = vmatpush3.msra.mxu1 %v6500_v61  ;;  %v3584_v57 = vld [vmem:[%s6235_s3] sm:$0xff] }
 0x3a6   : > { %4415 = vmatpush3.msra.mxu0 %v6587_v16  ;;  %4451 = vmatprep.subr.mxu1 %v6502_v54 }
 0x3a7   : > { %4416 = vmatprep.subr.mxu0 %v6588_v59  ;;  %3196 = vmatprep.mubr.f32.mxu0 %v6010_v10 }
 0x3a8   : > { %4417 = vmatpush3.msra.mxu0 %v6589_v31  ;;  %4452 = vmatpush3.msra.mxu1 %v6504_v32  ;;  %v3587_v31 = vsel %vm3585_vm15, %v3584_v57, 0 }
 0x3a9   : > { %3199 = vmatmul.mubr.f32.vlgmr.msra.gmra.mxu0 %v6028_v4  ;;  %3303 = vmatprep.mubr.f32.mxu1 %v6590_v48 }
 0x3aa   : > { %4456 = vmatprep.subr.mxu0 %v6591_v51  ;;  %4491 = vmatprep.subr.mxu1 %v6506_v60 }
 0x3ab   : > { %3307 = vmatmul.mubr.f32.vlgmr.msra.gmra.mxu1 %v2826_v30  ;;  %4457 = vmatpush3.msra.mxu0 %v6592_v6 }
 0x3ac   : > { %4492 = vmatpush3.msra.mxu1 %v5294_v20  ;;  %4458 = vmatprep.subr.mxu0 %v6593_v15  ;;  %v6598_v20 = vld [vmem:[#allocation15_spill] sm:$0xff] }
 0x3ad   : > { %4493 = vmatprep.subr.mxu1 %v5302_v42  ;;  %4459 = vmatpush3.msra.mxu0 %v6594_v21  ;;  %v6599_v42 = vld [vmem:[#allocation19_spill] sm:$0xff]  ;;  %v3658_v21 = vand.u32 4294901760, %v3587_v31 }
 0x3ae   : > { %4494 = vmatpush3.msra.mxu1 %v5311_v26  ;;  %4460 = vmatprep.subr.mxu0 %v6595_v14  ;;  %v6600_v26 = vld [vmem:[#allocation21_spill] sm:$0xff] }
 0x3af   : > { %4495 = vmatprep.subr.mxu1 %v5323_v1  ;;  %4461 = vmatpush3.msra.mxu0 %v6596_v0  ;;  %v6601_v1 = vld [vmem:[#allocation22_spill] sm:$0xff] }
 0x3b0   : > { %4496 = vmatpush3.msra.mxu1 %v5335_v52  ;;  %4462 = vmatprep.subr.mxu0 %v6597_v34  ;;  %v6602_v52 = vld [vmem:[#allocation23_spill] sm:$0xff] }
 0x3b1   : > { %4497 = vmatprep.subr.mxu1 %v5349_v8  ;;  %4463 = vmatpush3.msra.mxu0 %v6598_v20  ;;  %v6603_v8 = vld [vmem:[#allocation25_spill] sm:$0xff]  ;;  %v3659_v20 = vsub.f32 %v3587_v31, %v3658_v21 }
 0x3b2   : > { %4498 = vmatpush3.msra.mxu1 %v5363_v47  ;;  %4464 = vmatprep.subr.mxu0 %v6599_v42  ;;  %v6604_v47 = vld [vmem:[#allocation27_spill] sm:$0xff] }
 0x3b3   : > { %4499 = vmatprep.subr.mxu1 %v5405_v49  ;;  %4465 = vmatpush3.msra.mxu0 %v6600_v26  ;;  %v6605_v49 = vld [vmem:[#allocation29_spill] sm:$0xff] }
 0x3b4   : > { %4500 = vmatpush3.msra.mxu1 %v5418_v27  ;;  %4466 = vmatprep.subr.mxu0 %v6601_v1  ;;  %v6606_v27 = vld [vmem:[#allocation31_spill] sm:$0xff] }
 0x3b5   : > { %4501 = vmatprep.subr.mxu1 %v5431_v22  ;;  %4467 = vmatpush3.msra.mxu0 %v6602_v52  ;;  %v6607_v22 = vld [vmem:[#allocation36_spill] sm:$0xff] }
 0x3b6   : > { %4502 = vmatpush3.msra.mxu1 %v5445_v35  ;;  %4468 = vmatprep.subr.mxu0 %v6603_v8  ;;  %v6608_v35 = vld [vmem:[#allocation39_spill] sm:$0xff]  ;;  %v3660_v8 = vand.u32 4294901760, %v3659_v20 }
 0x3b7   : > { %4503 = vmatprep.subr.mxu1 %v5460_v2  ;;  %4469 = vmatpush3.msra.mxu0 %v6604_v47  ;;  %v6609_v2 = vld [vmem:[#allocation41_spill] sm:$0xff] }
 0x3b8   : > { %4504 = vmatpush3.msra.mxu1 %v5475_v36  ;;  %4470 = vmatprep.subr.mxu0 %v6605_v49  ;;  %v6610_v36 = vld [vmem:[#allocation43_spill] sm:$0xff] }
 0x3b9   : > { %4505 = vmatprep.subr.mxu1 %v5487_v62  ;;  %4471 = vmatpush3.msra.mxu0 %v6606_v27  ;;  %v6611_v62 = vld [vmem:[#allocation46_spill] sm:$0xff] }
 0x3ba   : > { %4506 = vmatpush3.msra.mxu1 %v5499_v41  ;;  %4472 = vmatprep.subr.mxu0 %v6607_v22  ;;  %v6612_v41 = vld [vmem:[#allocation49_spill] sm:$0xff] }
 0x3bb   : > { %4507 = vmatprep.subr.mxu1 %v5541_v11  ;;  %4473 = vmatpush3.msra.mxu0 %v6608_v35  ;;  %v6613_v11 = vld [vmem:[#allocation52_spill] sm:$0xff] }
 0x3bc   : > { %4508 = vmatpush3.msra.mxu1 %v5554_v33  ;;  %4474 = vmatprep.subr.mxu0 %v6609_v2  ;;  %v6614_v33 = vld [vmem:[#allocation54_spill] sm:$0xff] }
 0x3bd   : > { %4509 = vmatprep.subr.mxu1 %v5567_v13  ;;  %4475 = vmatpush3.msra.mxu0 %v6610_v36  ;;  %v6615_v13 = vld [vmem:[#allocation63_spill] sm:$0xff]  ;;  %v3661_v36 = vsub.f32 %v3659_v20, %v3660_v8 }
 0x3be   : > { %4510 = vmatpush3.msra.mxu1 %v5581_v56  ;;  %4476 = vmatprep.subr.mxu0 %v6611_v62  ;;  %v6616_v56 = vld [vmem:[#allocation67_spill] sm:$0xff] }
 0x3bf   : > { %4511 = vmatprep.subr.mxu1 %v5596_v58  ;;  %4477 = vmatpush3.msra.mxu0 %v6612_v41  ;;  %v6617_v58 = vld [vmem:[#allocation70_spill] sm:$0xff] }
 0x3c0   : > { %4512 = vmatpush3.msra.mxu1 %v5611_v53  ;;  %4478 = vmatprep.subr.mxu0 %v6613_v11  ;;  %v6618_v53 = vld [vmem:[#allocation73_spill] sm:$0xff]  ;;  %v3662_v11 = vand.u32 4294901760, %v3661_v36 }
 0x3c1   : > { %4513 = vmatprep.subr.mxu1 %v5623_v44  ;;  %4479 = vmatpush3.msra.mxu0 %v6614_v33  ;;  %v6619_v44 = vld [vmem:[#allocation77_spill] sm:$0xff] }
 0x3c2   : > { %4514 = vmatpush3.msra.mxu1 %v5635_v55  ;;  %4480 = vmatprep.subr.mxu0 %v6615_v13  ;;  %v6620_v55 = vld [vmem:[#allocation80_spill] sm:$0xff] }
 0x3c3   : > { %4515 = vmatprep.subr.mxu1 %v5677_v63  ;;  %4481 = vmatpush3.msra.mxu0 %v6616_v56  ;;  %v6621_v63 = vld [vmem:[#allocation83_spill] sm:$0xff] }
 0x3c4   : > { %4516 = vmatpush3.msra.mxu1 %v6492_v38  ;;  %4482 = vmatprep.subr.mxu0 %v6617_v58  ;;  %v6622_v38 = vld [vmem:[#allocation85_spill] sm:$0xff] }
 0x3c5   : > { %4517 = vmatprep.subr.mxu1 %v6494_v43  ;;  %4483 = vmatpush3.msra.mxu0 %v6618_v53  ;;  %v6623_v43 = vmov 0.0  }
 0x3c6   : > { %4518 = vmatpush3.msra.mxu1 %v6496_v7  ;;  %4484 = vmatprep.subr.mxu0 %v6619_v44 }
 0x3c7   : > { %4519 = vmatprep.subr.mxu1 %v6498_v18  ;;  %4485 = vmatpush3.msra.mxu0 %v6620_v55 }
 0x3c8   : > { %4520 = vmatpush3.msra.mxu1 %v6500_v61  ;;  %4486 = vmatprep.subr.mxu0 %v6621_v63 }
 0x3c9   : > { %4521 = vmatprep.subr.mxu1 %v6502_v54  ;;  %4487 = vmatpush3.msra.mxu0 %v6622_v38 }
 0x3ca   : > { %3473 = vmatprep.mubr.f32.mxu0 %v5999_v17  ;;  %4522 = vmatpush3.msra.mxu1 %v6504_v32 }
 0x3cb   : > { %3577 = vmatprep.mubr.f32.mxu1 %v5999_v17  ;;  %3475 = vmatmul.mubr.f32.vlgmr.msra.gmra.mxu0 %v6016_v19 }
 0x3cc   : > { %3579 = vmatmul.mubr.f32.vlgmr.msra.gmra.mxu1 %v6016_v19  ;;  %4538 = vmatprep.subr.mxu0 %v6623_v43 }
 0x3cd   : > { %4543 = vmatprep.subr.mxu1 %v6623_v43  ;;  %4540 = vmatprep.mubr.msk.f32.mxu0 %vm4605_vm14, %v6623_v43 }
 0x3ce   : > { %4545 = vmatprep.mubr.msk.f32.mxu1 %vm4605_vm14, %v6623_v43 }
 0x3df   : > { %v4173_v7 = vpop.f32.mrf.mxu1 }
 0x3e1   : > { %v4174_v37 = vpop.f32.mrf.mxu1 }
 0x3e2   : > { %v4175_v18 = vadd.f32 %v4174_v37, %v4173_v7 }
 0x3e7   : > { %v4138_v61 = vpop.f32.mrf.mxu0 }
 0x3e9   : > { %v4139_v54 = vpop.f32.mrf.mxu0 }
 0x3ea   : > { %v4140_v60 = vadd.f32 %v4139_v54, %v4138_v61 }
 0x3ec   : > { %v2198_v10 = vadd.f32 %v4175_v18, %v4140_v60 }
 0x400   : > { %v4243_v4 = vpop.f32.mrf.mxu1 }
 0x402   : > { %v4244_v30 = vpop.f32.mrf.mxu1 }
 0x403   : > { %v4245_v32 = vadd.f32 %v4244_v30, %v4243_v4 }
 0x408   : > { %v4208_v28 = vpop.f32.mrf.mxu0 }
 0x40a   : > { %v4209_v17 = vpop.f32.mrf.mxu0 }
 0x40b   : > { %v4210_v9 = vadd.f32 %v4209_v17, %v4208_v28 }
 0x40d   : > { %v2336_v3 = vadd.f32 %v4210_v9, %v2198_v10 }
 0x40f   : > { %v2444_v29 = vadd.f32 %v4245_v32, %v2336_v3 }
 0x422   : > { %v4313_v19 = vpop.f32.mrf.mxu1 }
 0x424   : > { %v4314_v23 = vpop.f32.mrf.mxu1 }
 0x425   : > { %v4315_v12 = vadd.f32 %v4314_v23, %v4313_v19 }
 0x429   : > { %v4278_v45 = vpop.f32.mrf.mxu0 }
 0x42b   : > { %v4279_v25 = vpop.f32.mrf.mxu0 }
 0x42c   : > { %v4280_v39 = vadd.f32 %v4279_v25, %v4278_v45 }
 0x42e   : > { %v2612_v24 = vadd.f32 %v4280_v39, %v2444_v29 }
 0x430   : > { %v2716_v5 = vadd.f32 %v4315_v12, %v2612_v24 }
 0x446   : > { %v4383_v46 = vpop.f32.mrf.mxu1 }
 0x448   : > { %v4384_v59 = vpop.f32.mrf.mxu1 }
 0x449   : > { %v4348_v40 = vpop.f32.mrf.mxu0  ;;  %v4385_v15 = vadd.f32 %v4384_v59, %v4383_v46 }
 0x44b   : > { %v4349_v50 = vpop.f32.mrf.mxu0 }
 0x44c   : > { %v4350_v6 = vadd.f32 %v4349_v50, %v4348_v40 }
 0x44e   : > { %v3063_v34 = vadd.f32 %v4385_v15, %v4350_v6 }
 0x469   : > { %v4418_v16 = vpop.f32.mrf.mxu0 }
 0x46b   : > { %v4453_v48 = vpop.f32.mrf.mxu1  ;;  %v4419_v51 = vpop.f32.mrf.mxu0 }
 0x46c   : > { %v4420_v14 = vadd.f32 %v4419_v51, %v4418_v16 }
 0x46d   : > { %v4454_v0 = vpop.f32.mrf.mxu1 }
 0x46e   : > { %v3201_v42 = vadd.f32 %v4420_v14, %v3063_v34  ;;  %v4455_v26 = vadd.f32 %v4454_v0, %v4453_v48 }
 0x470   : > { %v3309_v49 = vadd.f32 %v4455_v26, %v3201_v42 }
 0x48b   : > { %v4488_v1 = vpop.f32.mrf.mxu0 }
 0x48c   : > { %v4523_v52 = vpop.f32.mrf.mxu1 }
 0x48d   : > { %v4489_v47 = vpop.f32.mrf.mxu0 }
 0x48e   : > { %v4490_v27 = vadd.f32 %v4489_v47, %v4488_v1  ;;  %v4524_v22 = vpop.f32.mrf.mxu1 }
 0x48f   : > { %v4525_v2 = vadd.f32 %v4524_v22, %v4523_v52 }
 0x490   : > { %v3477_v35 = vadd.f32 %v4490_v27, %v3309_v49 }
 0x492   : > { %v3581_v62 = vadd.f32 %v4525_v2, %v3477_v35 }
 0x494   : > { %v3590_v41 = vsel %vm460_vm2, %v3581_v62, 0 }
 0x495   : > { %v3623_v33 = vand.u32 4294901760, %v3590_v41 }
 0x497   : > { %v3700_v13 = vsub.f32 %v3590_v41, %v3623_v33  ;;  %4539 = vmatpush3.msra.mxu0 %v3623_v33 }
 0x498   : > { %4541 = vmatmul.mubr.f32.vlgmr.msra.gmra.mxu0 %v3662_v11  ;;  %4548 = vmatprep.subr.mxu0 %v6623_v43 }
 0x499   : > { %4549 = vmatpush3.msra.mxu0 %v3700_v13  ;;  %4550 = vmatprep.mubr.msk.f32.mxu0 %vm4605_vm14, %v6623_v43  ;;  %v3701_v56 = vand.u32 4294901760, %v3700_v13 }
 0x49a   : > { %4558 = vmatprep.subr.mxu0 %v6623_v43 }
 0x49b   : > { %v3702_v58 = vsub.f32 %v3700_v13, %v3701_v56 }
 0x49c   : > { %4551 = vmatmul.mubr.f32.vlgmr.msra.gmra.mxu0 %v3659_v20 }
 0x49d   : > { %4559 = vmatpush3.msra.mxu0 %v3701_v56  ;;  %v3703_v53 = vand.u32 4294901760, %v3702_v58  ;;  %4560 = vmatprep.mubr.msk.f32.mxu0 %vm4605_vm14, %v6623_v43 }
 0x49f   : > { %4544 = vmatpush3.msra.mxu1 %v3703_v53 }
 0x4a0   : > { %4546 = vmatmul.mubr.f32.vlgmr.msra.gmra.mxu1 %v3658_v21  ;;  %4553 = vmatprep.subr.mxu1 %v6623_v43 }
 0x4a1   : > { %4554 = vmatpush3.msra.mxu1 %v3623_v33  ;;  %4555 = vmatprep.mubr.msk.f32.mxu1 %vm4605_vm14, %v6623_v43 }
 0x4a2   : > { %4563 = vmatprep.subr.mxu1 %v6623_v43  ;;  %4561 = vmatmul.mubr.f32.vlgmr.msra.gmra.mxu0 %v3658_v21 }
 0x4a4   : > { %4556 = vmatmul.mubr.f32.vlgmr.msra.gmra.mxu1 %v3660_v8 }
 0x4a5   : > { %4564 = vmatpush3.msra.mxu1 %v3623_v33  ;;  %4565 = vmatprep.mubr.msk.f32.mxu1 %vm4605_vm14, %v6623_v43 }
 0x4a8   : > { %4566 = vmatmul.mubr.f32.vlgmr.msra.gmra.mxu1 %v3658_v21 }
 0x558   : > { %v3664_v44 = vpop.f32.mrf.mxu0 }
 0x559   : > { %v3665_v7 = vadd.f32 %v3664_v44, %v2716_v5 }
 0x55a   : > { %v4542_v55 = vpop.f32.mrf.mxu0 }
 0x55c   : > { %v3814_v63 = vpop.f32.mrf.mxu0 }
 0x55e   : > { %v4552_v38 = vpop.f32.mrf.mxu0 }
 0x560   : > { %v3740_v37 = vpop.f32.mrf.mxu1 }
 0x561   : > { %v3741_v18 = vadd.f32 %v3740_v37, %v3665_v7 }
 0x562   : > { %v4547_v61 = vpop.f32.mrf.mxu1  ;;  %v3962_v54 = vpop.f32.mrf.mxu0 }
 0x563   : > { %v3815_v60 = vadd.f32 %v3814_v63, %v3741_v18 }
 0x564   : > { %v3888_v10 = vpop.f32.mrf.mxu1  ;;  %v4562_v4 = vpop.f32.mrf.mxu0 }
 0x565   : > { %v3889_v30 = vadd.f32 %v3888_v10, %v3815_v60 }
 0x566   : > { %v4557_v32 = vpop.f32.mrf.mxu1 }
 0x567   : > { %v3963_v28 = vadd.f32 %v3962_v54, %v3889_v30 }
 0x568   : > { %v4034_v43 = vpop.f32.mrf.mxu1 }
 0x569   : > { %v4035_v17 = vadd.f32 %v4034_v43, %v3963_v28 }
 0x56a   : > { %v4567_v9 = vpop.f32.mrf.mxu1 }
 0x56b   : > { %4039 = vst.msk [vmem:[%s249_s10] sm:$0xff] %vm4038_vm0, %v4035_v17 }
 0x56c PF: > { %s16_s21 = sadd.s32 1, %s4594_s21  }
 0x56d   : > { %p13_p4 = scmp.ge.s32.totalorder %s16_s21, 4  }
 0x56f   :  { %15 = sbr.rel (!%p13_p4) target bundleno = 1 (0x1), region = 74 }

</bundles_post_ra>
